<compile_context>
chip_gen: v7x
topology: tpu7x:2x2x1
jax: 0.10.0
libtpu: 0.0.40
codegen_flags: <defaults>
</compile_context>

<pallas_src>
import numpy as np

import jax
import jax.numpy as jnp
from jax import lax
from jax.experimental import pallas as pl
from jax.experimental.pallas import tpu as pltpu


# ----------------------------------------------------------------------------- kernel
def encoder_kernel(x_ref, w1l_ref, w1r_ref, b1_ref, w2l_ref, w2r_ref, b2_ref,
                   out_ref):
    """Fused encoder forward for B images (H-major layout).

    x_ref  : (H, B, W)              input images, H-major
    w1l_ref: (3, W, Wh*C1)          conv1 band matrices (ky-major), left pool column
    w1r_ref: (3, W, Wh*C1)          conv1 band matrices, right pool column
    b1_ref : (1, Wh*C1)             conv1 bias tiled over pooled columns
    w2l_ref: (3, Wh*C1, Wq*C2)      conv2 band matrices, left pool column
    w2r_ref: (3, Wh*C1, Wq*C2)      conv2 band matrices, right pool column
    b2_ref : (1, Wq*C2)             conv2 bias tiled over pooled columns
    out_ref: (Hq, B, Wq*C2)         encoder output block
    """
    H, B, W = x_ref.shape
    C1W = b1_ref.shape[1]            # Wh * C1
    C2W = b2_ref.shape[1]            # Wq * C2
    Hh = H // 2
    Hq = H // 4
    f32 = jnp.float32

    def conv_block(lhs_rows, band_ref, bias_ref):
        # sum over the 3 vertical taps; horizontal taps / channels / padding /
        # horizontal pool decimation are inside the band matrices.
        acc = jnp.dot(lhs_rows[0], band_ref[0], preferred_element_type=f32)
        acc = acc + jnp.dot(lhs_rows[1], band_ref[1], preferred_element_type=f32)
        acc = acc + jnp.dot(lhs_rows[2], band_ref[2], preferred_element_type=f32)
        return jnp.maximum(acc + bias_ref[...], 0.0)

    # ----------------- block 1: conv1(1->C1) + ReLU + 2x2 max-pool -----------------
    x = x_ref[...]                                          # (H, B, W)
    zr = jnp.zeros((1, B, W), f32)
    x_up = jnp.concatenate([zr, x[:-1]], axis=0)            # row h holds x[h-1]  (ky=0)
    x_dn = jnp.concatenate([x[1:], zr], axis=0)             # row h holds x[h+1]  (ky=2)
    HB = H * B
    xs = (x_up.reshape(HB, W), x.reshape(HB, W), x_dn.reshape(HB, W))

    # L/R = conv1+ReLU evaluated at the left / right column of each pool pair.
    y1 = jnp.maximum(conv_block(xs, w1l_ref, b1_ref),
                     conv_block(xs, w1r_ref, b1_ref))       # (H*B, Wh*C1), W pooled
    y1 = y1.reshape(Hh, 2, B, C1W)                          # leading-dim split: free
    p1 = jnp.maximum(y1[:, 0], y1[:, 1])                    # (Hh, B, Wh*C1), H pooled

    # ----------------- block 2: conv2(C1->C2) + ReLU + 2x2 max-pool ----------------
    zr2 = jnp.zeros((1, B, C1W), f32)
    p_up = jnp.concatenate([zr2, p1[:-1]], axis=0)
    p_dn = jnp.concatenate([p1[1:], zr2], axis=0)
    HhB = Hh * B
    ps = (p_up.reshape(HhB, C1W), p1.reshape(HhB, C1W), p_dn.reshape(HhB, C1W))

    y2 = jnp.maximum(conv_block(ps, w2l_ref, b2_ref),
                     conv_block(ps, w2r_ref, b2_ref))       # (Hh*B, Wq*C2), W pooled
    y2 = y2.reshape(Hq, 2, B, C2W)
    out_ref[...] = jnp.maximum(y2[:, 0], y2[:, 1])          # (Hq, B, Wq*C2)


# ----------------------------------------------------------------------------- wrapper
def _pick_batch_block(n):
    # Prefer >= 2 grid steps (keeps both v7x TensorCores busy) with a sublane-friendly
    # block size; fall back to a single step over the whole batch.
    for b in (8, 4, 2):
        if n % b == 0 and n // b >= 2:
            return b
    return n


def _make_conv1_bands(w1_oihw, W):
    """Band matrices for conv1 (Cin==1).  Shape (3, W, Wh*C1) each (L and R)."""
    C1 = w1_oihw.shape[0]
    Wh = W // 2
    w1_t = jnp.transpose(w1_oihw[:, 0, :, :], (1, 2, 0))     # (ky, kx, C1)

    def sel(w_out):                                          # (3, W, Wh) 0/1 selector
        s = np.zeros((3, W, Wh), np.float32)
        p = np.arange(Wh)
        for kx in range(3):
            w_in = w_out + kx - 1                            # horizontal 'same' pad:
            ok = (w_in >= 0) & (w_in < W)                    # out-of-range taps absent
            s[kx, w_in[ok], p[ok]] = 1.0
        return s

    base = 2 * np.arange(Wh)
    bandL = jnp.einsum('kip,ykc->yipc', sel(base), w1_t).reshape(3, W, Wh * C1)
    bandR = jnp.einsum('kip,ykc->yipc', sel(base + 1), w1_t).reshape(3, W, Wh * C1)
    return bandL, bandR


def _make_conv2_bands(w2_oihw, Wh):
    """Band matrices for conv2.  Shape (3, Wh*C1, Wq*C2) each (L and R)."""
    C2, C1 = w2_oihw.shape[0], w2_oihw.shape[1]
    Wq = Wh // 2
    w2_t = jnp.transpose(w2_oihw, (2, 3, 1, 0))               # (ky, kx, C1, C2)

    def sel(w_out):                                           # (3, Wh, Wq) selector
        s = np.zeros((3, Wh, Wq), np.float32)
        q = np.arange(Wq)
        for kx in range(3):
            w_in = w_out + kx - 1
            ok = (w_in >= 0) & (w_in < Wh)
            s[kx, w_in[ok], q[ok]] = 1.0
        return s

    base = 2 * np.arange(Wq)
    bandL = jnp.einsum('kpq,ykab->ypaqb', sel(base), w2_t).reshape(3, Wh * C1, Wq * C2)
    bandR = jnp.einsum('kpq,ykab->ypaqb', sel(base + 1), w2_t).reshape(3, Wh * C1, Wq * C2)
    return bandL, bandR


def encoder_forward(x_nchw, params):
    """Pallas Encoder forward.  x: NCHW, params: [(w1,b1),(w2,b2)] with OIHW weights."""
    (w1, b1), (w2, b2) = params
    N, Cin, H, W = x_nchw.shape
    C1 = w1.shape[0]
    C2 = w2.shape[0]
    assert Cin == 1 and w1.shape[1] == 1 and w2.shape[1] == C1
    assert H % 4 == 0 and W % 4 == 0
    Wh, Hq, Wq = W // 2, H // 4, W // 4

    B = _pick_batch_block(N)
    grid = (N // B,)

    # Cin == 1 -> NCHW collapses to (N,H,W) by a free reshape; one small transpose to
    # H-major so all vertical taps / pools in-kernel are leading-dim (relayout-free) ops.
    x_hnw = jnp.transpose(x_nchw.astype(jnp.float32).reshape(N, H, W), (1, 0, 2))

    w1L, w1R = _make_conv1_bands(w1.astype(jnp.float32), W)
    w2L, w2R = _make_conv2_bands(w2.astype(jnp.float32), Wh)
    b1row = jnp.tile(b1.astype(jnp.float32), Wh)[None, :]     # (1, Wh*C1)
    b2row = jnp.tile(b2.astype(jnp.float32), Wq)[None, :]     # (1, Wq*C2)

    out_hnw = pl.pallas_call(
        encoder_kernel,
        out_shape=jax.ShapeDtypeStruct((Hq, N, Wq * C2), jnp.float32),
        grid=grid,
        in_specs=[
            pl.BlockSpec((H, B, W), lambda n: (0, n, 0)),
            pl.BlockSpec((3, W, Wh * C1), lambda n: (0, 0, 0)),
            pl.BlockSpec((3, W, Wh * C1), lambda n: (0, 0, 0)),
            pl.BlockSpec((1, Wh * C1), lambda n: (0, 0)),
            pl.BlockSpec((3, Wh * C1, Wq * C2), lambda n: (0, 0, 0)),
            pl.BlockSpec((3, Wh * C1, Wq * C2), lambda n: (0, 0, 0)),
            pl.BlockSpec((1, Wq * C2), lambda n: (0, 0)),
        ],
        out_specs=pl.BlockSpec((Hq, B, Wq * C2), lambda n: (0, n, 0)),
        compiler_params=pltpu.CompilerParams(dimension_semantics=("parallel",)),
    )(x_hnw, w1L, w1R, b1row, w2L, w2R, b2row)

    # (Hq, N, Wq*C2) -> NCHW (tiny: 64 floats per image)
    out = out_hnw.reshape(Hq, N, Wq, C2)
    return jnp.transpose(out, (1, 3, 0, 2))


# ----------------------------------------------------------------------------- reference
def encoder_reference(x_nchw, params):
    """Pure-JAX reference (lax conv + reduce_window), OIHW weights like PyTorch."""
    x = x_nchw.astype(jnp.float32)
    for w, b in params:
        y = lax.conv_general_dilated(
            x, w.astype(jnp.float32), window_strides=(1, 1), padding="SAME",
            dimension_numbers=("NCHW", "OIHW", "NCHW"))
        y = jnp.maximum(y + b.reshape(1, -1, 1, 1).astype(jnp.float32), 0.0)
        x = lax.reduce_window(y, -jnp.inf, lax.max,
                              window_dimensions=(1, 1, 2, 2),
                              window_strides=(1, 1, 2, 2), padding="VALID")
    return x


if __name__ == "__main__":
    key = jax.random.PRNGKey(0)
    k_x, k_w1, k_b1, k_w2, k_b2 = jax.random.split(key, 5)

    # MNIST-like single-channel input; N=16 -> B=8 images/grid-step, grid of 2.
    N, H, W = 16, 16, 16
    x = jax.random.normal(k_x, (N, 1, H, W), dtype=jnp.float32)

    # PyTorch-layout (OIHW) conv weights: conv1 1->16, conv2 16->4.
    w1 = jax.random.normal(k_w1, (16, 1, 3, 3), dtype=jnp.float32) * 0.2
    b1 = jax.random.normal(k_b1, (16,), dtype=jnp.float32) * 0.1
    w2 = jax.random.normal(k_w2, (4, 16, 3, 3), dtype=jnp.float32) * 0.1
    b2 = jax.random.normal(k_b2, (4,), dtype=jnp.float32) * 0.1
    params = [(w1, b1), (w2, b2)]

    fwd = jax.jit(encoder_forward)
    out = jax.block_until_ready(fwd(x, params))
    assert out.shape == (N, 4, H // 4, W // 4), out.shape

    ref = jax.block_until_ready(encoder_reference(x, params))
    max_err = float(jnp.max(jnp.abs(out - ref)))
    assert jnp.allclose(out, ref, rtol=1e-4, atol=1e-4), max_err

    print("KERNEL_OK")
</pallas_src>

<mosaic_0001>
module attributes {stable_mosaic.version = 11 : i64} {
  func.func @encoder_kernel(%arg0: i32, %arg1: memref<16x8x16xf32, #tpu.memory_space<vmem>>, %arg2: memref<3x16x128xf32, #tpu.memory_space<vmem>>, %arg3: memref<3x16x128xf32, #tpu.memory_space<vmem>>, %arg4: memref<1x128xf32, #tpu.memory_space<vmem>>, %arg5: memref<3x128x16xf32, #tpu.memory_space<vmem>>, %arg6: memref<3x128x16xf32, #tpu.memory_space<vmem>>, %arg7: memref<1x16xf32, #tpu.memory_space<vmem>>, %arg8: memref<4x8x16xf32, #tpu.memory_space<vmem>>) attributes {dimension_semantics = [#tpu.dimension_semantics<parallel>], iteration_bounds = array<i64: 2>, scalar_prefetch = 0 : i64, scratch_operands = 0 : i64, tpu.core_type = #tpu.core_type<tc>, window_params = [{transform_indices = @transform_0, window_bounds = array<i64: 16, 8, 16>}, {pipeline_mode = #tpu.pipeline_mode<synchronous>, transform_indices = @transform_1, window_bounds = array<i64: 3, 16, 128>}, {pipeline_mode = #tpu.pipeline_mode<synchronous>, transform_indices = @transform_2, window_bounds = array<i64: 3, 16, 128>}, {pipeline_mode = #tpu.pipeline_mode<synchronous>, transform_indices = @transform_3, window_bounds = array<i64: 1, 128>}, {pipeline_mode = #tpu.pipeline_mode<synchronous>, transform_indices = @transform_4, window_bounds = array<i64: 3, 128, 16>}, {pipeline_mode = #tpu.pipeline_mode<synchronous>, transform_indices = @transform_5, window_bounds = array<i64: 3, 128, 16>}, {pipeline_mode = #tpu.pipeline_mode<synchronous>, transform_indices = @transform_6, window_bounds = array<i64: 1, 16>}, {transform_indices = @transform_7, window_bounds = array<i64: 4, 8, 16>}]} {
    %c0 = arith.constant 0 : index
    %c0_0 = arith.constant 0 : index
    %c0_1 = arith.constant 0 : index
    %0 = vector.load %arg1[%c0, %c0_0, %c0_1] : memref<16x8x16xf32, #tpu.memory_space<vmem>>, vector<16x8x16xf32>
    %cst = arith.constant 0.000000e+00 : f32
    %1 = vector.broadcast %cst : f32 to vector<1x8x16xf32>
    %2 = vector.extract_strided_slice %0 {offsets = [0, 0, 0], sizes = [15, 8, 16], strides = [1, 1, 1]} : vector<16x8x16xf32> to vector<15x8x16xf32>
    %3 = tpu.concatenate %1, %2 in 0 : vector<1x8x16xf32>, vector<15x8x16xf32> -> vector<16x8x16xf32>
    %4 = vector.extract_strided_slice %0 {offsets = [1, 0, 0], sizes = [15, 8, 16], strides = [1, 1, 1]} : vector<16x8x16xf32> to vector<15x8x16xf32>
    %5 = tpu.concatenate %4, %1 in 0 : vector<15x8x16xf32>, vector<1x8x16xf32> -> vector<16x8x16xf32>
    %6 = vector.shape_cast %3 : vector<16x8x16xf32> to vector<128x16xf32>
    %7 = vector.shape_cast %0 : vector<16x8x16xf32> to vector<128x16xf32>
    %8 = vector.shape_cast %5 : vector<16x8x16xf32> to vector<128x16xf32>
    %c0_2 = arith.constant 0 : index
    %c0_3 = arith.constant 0 : index
    %c0_4 = arith.constant 0 : index
    %9 = vector.load %arg2[%c0_2, %c0_3, %c0_4] : memref<3x16x128xf32, #tpu.memory_space<vmem>>, vector<1x16x128xf32>
    %10 = vector.shape_cast %9 : vector<1x16x128xf32> to vector<16x128xf32>
    %cst_5 = arith.constant dense<0.000000e+00> : vector<128x128xf32>
    %11 = tpu.matmul %6, %10, %cst_5 {dimension_numbers = #tpu.dot_dimension_numbers<[1], [0], [0], [1], [0, 0, 1, 1], [], []>} : vector<128x16xf32>, vector<16x128xf32>, vector<128x128xf32> -> vector<128x128xf32>
    %c1 = arith.constant 1 : index
    %c0_6 = arith.constant 0 : index
    %c0_7 = arith.constant 0 : index
    %12 = vector.load %arg2[%c1, %c0_6, %c0_7] : memref<3x16x128xf32, #tpu.memory_space<vmem>>, vector<1x16x128xf32>
    %13 = vector.shape_cast %12 : vector<1x16x128xf32> to vector<16x128xf32>
    %cst_8 = arith.constant dense<0.000000e+00> : vector<128x128xf32>
    %14 = tpu.matmul %7, %13, %cst_8 {dimension_numbers = #tpu.dot_dimension_numbers<[1], [0], [0], [1], [0, 0, 1, 1], [], []>} : vector<128x16xf32>, vector<16x128xf32>, vector<128x128xf32> -> vector<128x128xf32>
    %15 = arith.addf %11, %14 : vector<128x128xf32>
    %c2 = arith.constant 2 : index
    %c0_9 = arith.constant 0 : index
    %c0_10 = arith.constant 0 : index
    %16 = vector.load %arg2[%c2, %c0_9, %c0_10] : memref<3x16x128xf32, #tpu.memory_space<vmem>>, vector<1x16x128xf32>
    %17 = vector.shape_cast %16 : vector<1x16x128xf32> to vector<16x128xf32>
    %cst_11 = arith.constant dense<0.000000e+00> : vector<128x128xf32>
    %18 = tpu.matmul %8, %17, %cst_11 {dimension_numbers = #tpu.dot_dimension_numbers<[1], [0], [0], [1], [0, 0, 1, 1], [], []>} : vector<128x16xf32>, vector<16x128xf32>, vector<128x128xf32> -> vector<128x128xf32>
    %19 = arith.addf %15, %18 : vector<128x128xf32>
    %c0_12 = arith.constant 0 : index
    %c0_13 = arith.constant 0 : index
    %20 = vector.load %arg4[%c0_12, %c0_13] : memref<1x128xf32, #tpu.memory_space<vmem>>, vector<1x128xf32>
    %21 = vector.broadcast %20 : vector<1x128xf32> to vector<128x128xf32>
    %22 = arith.addf %19, %21 : vector<128x128xf32>
    %cst_14 = arith.constant 0.000000e+00 : f32
    %23 = vector.broadcast %cst_14 : f32 to vector<128x128xf32>
    %24 = arith.maximumf %22, %23 : vector<128x128xf32>
    %c0_15 = arith.constant 0 : index
    %c0_16 = arith.constant 0 : index
    %c0_17 = arith.constant 0 : index
    %25 = vector.load %arg3[%c0_15, %c0_16, %c0_17] : memref<3x16x128xf32, #tpu.memory_space<vmem>>, vector<1x16x128xf32>
    %26 = vector.shape_cast %25 : vector<1x16x128xf32> to vector<16x128xf32>
    %cst_18 = arith.constant dense<0.000000e+00> : vector<128x128xf32>
    %27 = tpu.matmul %6, %26, %cst_18 {dimension_numbers = #tpu.dot_dimension_numbers<[1], [0], [0], [1], [0, 0, 1, 1], [], []>} : vector<128x16xf32>, vector<16x128xf32>, vector<128x128xf32> -> vector<128x128xf32>
    %c1_19 = arith.constant 1 : index
    %c0_20 = arith.constant 0 : index
    %c0_21 = arith.constant 0 : index
    %28 = vector.load %arg3[%c1_19, %c0_20, %c0_21] : memref<3x16x128xf32, #tpu.memory_space<vmem>>, vector<1x16x128xf32>
    %29 = vector.shape_cast %28 : vector<1x16x128xf32> to vector<16x128xf32>
    %cst_22 = arith.constant dense<0.000000e+00> : vector<128x128xf32>
    %30 = tpu.matmul %7, %29, %cst_22 {dimension_numbers = #tpu.dot_dimension_numbers<[1], [0], [0], [1], [0, 0, 1, 1], [], []>} : vector<128x16xf32>, vector<16x128xf32>, vector<128x128xf32> -> vector<128x128xf32>
    %31 = arith.addf %27, %30 : vector<128x128xf32>
    %c2_23 = arith.constant 2 : index
    %c0_24 = arith.constant 0 : index
    %c0_25 = arith.constant 0 : index
    %32 = vector.load %arg3[%c2_23, %c0_24, %c0_25] : memref<3x16x128xf32, #tpu.memory_space<vmem>>, vector<1x16x128xf32>
    %33 = vector.shape_cast %32 : vector<1x16x128xf32> to vector<16x128xf32>
    %cst_26 = arith.constant dense<0.000000e+00> : vector<128x128xf32>
    %34 = tpu.matmul %8, %33, %cst_26 {dimension_numbers = #tpu.dot_dimension_numbers<[1], [0], [0], [1], [0, 0, 1, 1], [], []>} : vector<128x16xf32>, vector<16x128xf32>, vector<128x128xf32> -> vector<128x128xf32>
    %35 = arith.addf %31, %34 : vector<128x128xf32>
    %c0_27 = arith.constant 0 : index
    %c0_28 = arith.constant 0 : index
    %36 = vector.load %arg4[%c0_27, %c0_28] : memref<1x128xf32, #tpu.memory_space<vmem>>, vector<1x128xf32>
    %37 = vector.broadcast %36 : vector<1x128xf32> to vector<128x128xf32>
    %38 = arith.addf %35, %37 : vector<128x128xf32>
    %cst_29 = arith.constant 0.000000e+00 : f32
    %39 = vector.broadcast %cst_29 : f32 to vector<128x128xf32>
    %40 = arith.maximumf %38, %39 : vector<128x128xf32>
    %41 = arith.maximumf %24, %40 : vector<128x128xf32>
    %42 = vector.shape_cast %41 : vector<128x128xf32> to vector<8x2x8x128xf32>
    %43 = vector.extract_strided_slice %42 {offsets = [0, 0, 0, 0], sizes = [8, 1, 8, 128], strides = [1, 1, 1, 1]} : vector<8x2x8x128xf32> to vector<8x1x8x128xf32>
    %44 = vector.shape_cast %43 : vector<8x1x8x128xf32> to vector<8x8x128xf32>
    %45 = vector.extract_strided_slice %42 {offsets = [0, 1, 0, 0], sizes = [8, 1, 8, 128], strides = [1, 1, 1, 1]} : vector<8x2x8x128xf32> to vector<8x1x8x128xf32>
    %46 = vector.shape_cast %45 : vector<8x1x8x128xf32> to vector<8x8x128xf32>
    %47 = arith.maximumf %44, %46 : vector<8x8x128xf32>
    %cst_30 = arith.constant 0.000000e+00 : f32
    %48 = vector.broadcast %cst_30 : f32 to vector<1x8x128xf32>
    %49 = vector.extract_strided_slice %47 {offsets = [0, 0, 0], sizes = [7, 8, 128], strides = [1, 1, 1]} : vector<8x8x128xf32> to vector<7x8x128xf32>
    %50 = tpu.concatenate %48, %49 in 0 : vector<1x8x128xf32>, vector<7x8x128xf32> -> vector<8x8x128xf32>
    %51 = vector.extract_strided_slice %47 {offsets = [1, 0, 0], sizes = [7, 8, 128], strides = [1, 1, 1]} : vector<8x8x128xf32> to vector<7x8x128xf32>
    %52 = tpu.concatenate %51, %48 in 0 : vector<7x8x128xf32>, vector<1x8x128xf32> -> vector<8x8x128xf32>
    %53 = vector.shape_cast %50 : vector<8x8x128xf32> to vector<64x128xf32>
    %54 = vector.shape_cast %47 : vector<8x8x128xf32> to vector<64x128xf32>
    %55 = vector.shape_cast %52 : vector<8x8x128xf32> to vector<64x128xf32>
    %c0_31 = arith.constant 0 : index
    %c0_32 = arith.constant 0 : index
    %c0_33 = arith.constant 0 : index
    %56 = vector.load %arg5[%c0_31, %c0_32, %c0_33] : memref<3x128x16xf32, #tpu.memory_space<vmem>>, vector<1x128x16xf32>
    %57 = vector.shape_cast %56 : vector<1x128x16xf32> to vector<128x16xf32>
    %cst_34 = arith.constant dense<0.000000e+00> : vector<64x16xf32>
    %58 = tpu.matmul %53, %57, %cst_34 {dimension_numbers = #tpu.dot_dimension_numbers<[1], [0], [0], [1], [0, 0, 1, 1], [], []>} : vector<64x128xf32>, vector<128x16xf32>, vector<64x16xf32> -> vector<64x16xf32>
    %c1_35 = arith.constant 1 : index
    %c0_36 = arith.constant 0 : index
    %c0_37 = arith.constant 0 : index
    %59 = vector.load %arg5[%c1_35, %c0_36, %c0_37] : memref<3x128x16xf32, #tpu.memory_space<vmem>>, vector<1x128x16xf32>
    %60 = vector.shape_cast %59 : vector<1x128x16xf32> to vector<128x16xf32>
    %cst_38 = arith.constant dense<0.000000e+00> : vector<64x16xf32>
    %61 = tpu.matmul %54, %60, %cst_38 {dimension_numbers = #tpu.dot_dimension_numbers<[1], [0], [0], [1], [0, 0, 1, 1], [], []>} : vector<64x128xf32>, vector<128x16xf32>, vector<64x16xf32> -> vector<64x16xf32>
    %62 = arith.addf %58, %61 : vector<64x16xf32>
    %c2_39 = arith.constant 2 : index
    %c0_40 = arith.constant 0 : index
    %c0_41 = arith.constant 0 : index
    %63 = vector.load %arg5[%c2_39, %c0_40, %c0_41] : memref<3x128x16xf32, #tpu.memory_space<vmem>>, vector<1x128x16xf32>
    %64 = vector.shape_cast %63 : vector<1x128x16xf32> to vector<128x16xf32>
    %cst_42 = arith.constant dense<0.000000e+00> : vector<64x16xf32>
    %65 = tpu.matmul %55, %64, %cst_42 {dimension_numbers = #tpu.dot_dimension_numbers<[1], [0], [0], [1], [0, 0, 1, 1], [], []>} : vector<64x128xf32>, vector<128x16xf32>, vector<64x16xf32> -> vector<64x16xf32>
    %66 = arith.addf %62, %65 : vector<64x16xf32>
    %c0_43 = arith.constant 0 : index
    %c0_44 = arith.constant 0 : index
    %67 = vector.load %arg7[%c0_43, %c0_44] : memref<1x16xf32, #tpu.memory_space<vmem>>, vector<1x16xf32>
    %68 = vector.broadcast %67 : vector<1x16xf32> to vector<64x16xf32>
    %69 = arith.addf %66, %68 : vector<64x16xf32>
    %cst_45 = arith.constant 0.000000e+00 : f32
    %70 = vector.broadcast %cst_45 : f32 to vector<64x16xf32>
    %71 = arith.maximumf %69, %70 : vector<64x16xf32>
    %c0_46 = arith.constant 0 : index
    %c0_47 = arith.constant 0 : index
    %c0_48 = arith.constant 0 : index
    %72 = vector.load %arg6[%c0_46, %c0_47, %c0_48] : memref<3x128x16xf32, #tpu.memory_space<vmem>>, vector<1x128x16xf32>
    %73 = vector.shape_cast %72 : vector<1x128x16xf32> to vector<128x16xf32>
    %cst_49 = arith.constant dense<0.000000e+00> : vector<64x16xf32>
    %74 = tpu.matmul %53, %73, %cst_49 {dimension_numbers = #tpu.dot_dimension_numbers<[1], [0], [0], [1], [0, 0, 1, 1], [], []>} : vector<64x128xf32>, vector<128x16xf32>, vector<64x16xf32> -> vector<64x16xf32>
    %c1_50 = arith.constant 1 : index
    %c0_51 = arith.constant 0 : index
    %c0_52 = arith.constant 0 : index
    %75 = vector.load %arg6[%c1_50, %c0_51, %c0_52] : memref<3x128x16xf32, #tpu.memory_space<vmem>>, vector<1x128x16xf32>
    %76 = vector.shape_cast %75 : vector<1x128x16xf32> to vector<128x16xf32>
    %cst_53 = arith.constant dense<0.000000e+00> : vector<64x16xf32>
    %77 = tpu.matmul %54, %76, %cst_53 {dimension_numbers = #tpu.dot_dimension_numbers<[1], [0], [0], [1], [0, 0, 1, 1], [], []>} : vector<64x128xf32>, vector<128x16xf32>, vector<64x16xf32> -> vector<64x16xf32>
    %78 = arith.addf %74, %77 : vector<64x16xf32>
    %c2_54 = arith.constant 2 : index
    %c0_55 = arith.constant 0 : index
    %c0_56 = arith.constant 0 : index
    %79 = vector.load %arg6[%c2_54, %c0_55, %c0_56] : memref<3x128x16xf32, #tpu.memory_space<vmem>>, vector<1x128x16xf32>
    %80 = vector.shape_cast %79 : vector<1x128x16xf32> to vector<128x16xf32>
    %cst_57 = arith.constant dense<0.000000e+00> : vector<64x16xf32>
    %81 = tpu.matmul %55, %80, %cst_57 {dimension_numbers = #tpu.dot_dimension_numbers<[1], [0], [0], [1], [0, 0, 1, 1], [], []>} : vector<64x128xf32>, vector<128x16xf32>, vector<64x16xf32> -> vector<64x16xf32>
    %82 = arith.addf %78, %81 : vector<64x16xf32>
    %c0_58 = arith.constant 0 : index
    %c0_59 = arith.constant 0 : index
    %83 = vector.load %arg7[%c0_58, %c0_59] : memref<1x16xf32, #tpu.memory_space<vmem>>, vector<1x16xf32>
    %84 = vector.broadcast %83 : vector<1x16xf32> to vector<64x16xf32>
    %85 = arith.addf %82, %84 : vector<64x16xf32>
    %cst_60 = arith.constant 0.000000e+00 : f32
    %86 = vector.broadcast %cst_60 : f32 to vector<64x16xf32>
    %87 = arith.maximumf %85, %86 : vector<64x16xf32>
    %88 = arith.maximumf %71, %87 : vector<64x16xf32>
    %89 = vector.shape_cast %88 : vector<64x16xf32> to vector<4x2x8x16xf32>
    %90 = vector.extract_strided_slice %89 {offsets = [0, 0, 0, 0], sizes = [4, 1, 8, 16], strides = [1, 1, 1, 1]} : vector<4x2x8x16xf32> to vector<4x1x8x16xf32>
    %91 = vector.shape_cast %90 : vector<4x1x8x16xf32> to vector<4x8x16xf32>
    %92 = vector.extract_strided_slice %89 {offsets = [0, 1, 0, 0], sizes = [4, 1, 8, 16], strides = [1, 1, 1, 1]} : vector<4x2x8x16xf32> to vector<4x1x8x16xf32>
    %93 = vector.shape_cast %92 : vector<4x1x8x16xf32> to vector<4x8x16xf32>
    %94 = arith.maximumf %91, %93 : vector<4x8x16xf32>
    %c0_61 = arith.constant 0 : index
    %c0_62 = arith.constant 0 : index
    %c0_63 = arith.constant 0 : index
    %95 = vector.load %arg8[%c0_61, %c0_62, %c0_63] : memref<4x8x16xf32, #tpu.memory_space<vmem>>, vector<4x8x16xf32>
    tpu.vector_store %arg8[%c0_61, %c0_62, %c0_63], %94 {strides = array<i32>} : memref<4x8x16xf32, #tpu.memory_space<vmem>>, vector<4x8x16xf32>,
    return
  }
  func.func @transform_0(%arg0: i32) -> (i32, i32, i32) {
    %c0_i32 = arith.constant 0 : i32
    %c0_i32_0 = arith.constant 0 : i32
    %c0_i32_1 = arith.constant 0 : i32
    return %c0_i32, %arg0, %c0_i32_0 : i32, i32, i32
  }
  func.func @transform_1(%arg0: i32) -> (i32, i32, i32) {
    %c0_i32 = arith.constant 0 : i32
    %c0_i32_0 = arith.constant 0 : i32
    %c0_i32_1 = arith.constant 0 : i32
    %c0_i32_2 = arith.constant 0 : i32
    return %c0_i32, %c0_i32_0, %c0_i32_1 : i32, i32, i32
  }
  func.func @transform_2(%arg0: i32) -> (i32, i32, i32) {
    %c0_i32 = arith.constant 0 : i32
    %c0_i32_0 = arith.constant 0 : i32
    %c0_i32_1 = arith.constant 0 : i32
    %c0_i32_2 = arith.constant 0 : i32
    return %c0_i32, %c0_i32_0, %c0_i32_1 : i32, i32, i32
  }
  func.func @transform_3(%arg0: i32) -> (i32, i32) {
    %c0_i32 = arith.constant 0 : i32
    %c0_i32_0 = arith.constant 0 : i32
    %c0_i32_1 = arith.constant 0 : i32
    return %c0_i32, %c0_i32_0 : i32, i32
  }
  func.func @transform_4(%arg0: i32) -> (i32, i32, i32) {
    %c0_i32 = arith.constant 0 : i32
    %c0_i32_0 = arith.constant 0 : i32
    %c0_i32_1 = arith.constant 0 : i32
    %c0_i32_2 = arith.constant 0 : i32
    return %c0_i32, %c0_i32_0, %c0_i32_1 : i32, i32, i32
  }
  func.func @transform_5(%arg0: i32) -> (i32, i32, i32) {
    %c0_i32 = arith.constant 0 : i32
    %c0_i32_0 = arith.constant 0 : i32
    %c0_i32_1 = arith.constant 0 : i32
    %c0_i32_2 = arith.constant 0 : i32
    return %c0_i32, %c0_i32_0, %c0_i32_1 : i32, i32, i32
  }
  func.func @transform_6(%arg0: i32) -> (i32, i32) {
    %c0_i32 = arith.constant 0 : i32
    %c0_i32_0 = arith.constant 0 : i32
    %c0_i32_1 = arith.constant 0 : i32
    return %c0_i32, %c0_i32_0 : i32, i32
  }
  func.func @transform_7(%arg0: i32) -> (i32, i32, i32) {
    %c0_i32 = arith.constant 0 : i32
    %c0_i32_0 = arith.constant 0 : i32
    %c0_i32_1 = arith.constant 0 : i32
    return %c0_i32, %arg0, %c0_i32_0 : i32, i32, i32
  }
}

</mosaic_0001>

<bundles_post_ra>
// kernel: tile.14
= control target key start
LH: loop header
LB: loop body
LE: loop exit
PB: predicated region body
PF: predicated region fallthrough
CT: control target
= control target key end

     0   :  { %s67_s10 = smov 112   ;;  %s68_s11 = smov 80   ;;  %vm3_vm0 = vcmask 130048   ;;  %vm9_vm1 = vcmask 1048448   ;;  %vm15_vm2 = vcmask 917248   ;;  %vm21_vm3 = vcmask 786048   ;;  %s111_s0 = inlined_call_operand.vmem [shape: f32[8,16], index: 0, kind: input, shape index: {}]   ;;  %s112_s1 = inlined_call_operand.vmem [shape: f32[1,128], index: 1, kind: output, shape index: {}]  }
   0x1   :  { %v53_v0 = vld [vmem:[%s111_s0 + $0x7] sm:$0x1]   ;;  %v55_v1 = vld [vmem:[%s111_s0 + $0x5] sm:$0x1]   ;;  %v54_v2 = vld [vmem:[%s111_s0 + $0x6] sm:$0x1]  }
   0x2   :  { %7 = vrot.lane.b32.xlu0 %v53_v0, %s67_s10  ;;  %19 = vrot.lane.b32.xlu1 %v55_v1, %s68_s11  ;;  %v56_v3 = vld [vmem:[%s111_s0 + $0x4] sm:$0x1]   ;;  %v2_v4 = vld [vmem:[%s111_s0] sm:$0x1]   ;;  %s69_s18 = smov 96   ;;  %s70_s19 = smov 64  }
   0x3   :  { %4 = vst.msk [vmem:[#allocation0] sm:$0x1] %vm3_vm0, %v2_v4   ;;  %v57_v5 = vld [vmem:[%s111_s0 + $0x3] sm:$0x1]   ;;  %v58_v6 = vld [vmem:[%s111_s0 + $0x2] sm:$0x1]  }
   0x4   :  { %s71_s24 = smov 48   ;;  %s72_s25 = smov 32   ;;  %v59_v7 = vld [vmem:[%s111_s0 + $0x1] sm:$0x1]   ;;  %vm27_vm4 = vcmask 654848   ;;  %vm33_vm5 = vcmask 523648  }
   0x5   :  { %s73_s0 = smov 16   ;;  %vm39_vm6 = vcmask 392448   ;;  %vm45_vm7 = vcmask 261248  }
   0x6   :  { %13 = vrot.lane.b32.xlu0 %v54_v2, %s69_s18  ;;  %25 = vrot.lane.b32.xlu1 %v56_v3, %s70_s19 }
   0xa   :  { %31 = vrot.lane.b32.xlu0 %v57_v5, %s71_s24  ;;  %37 = vrot.lane.b32.xlu1 %v58_v6, %s72_s25 }
   0xe   :  { %43 = vrot.lane.b32.xlu0 %v59_v7, %s73_s0 }
  0x74   :  { %v8_v8 = vpop.permute.xlu0 %7   ;;  %v20_v9 = vpop.permute.xlu1 %19  }
  0x75   :  { %10 = vst.msk [vmem:[#allocation0] sm:$0x1] %vm9_vm1, %v8_v8  }
  0x78   :  { %v14_v10 = vpop.permute.xlu0 %13   ;;  %v26_v11 = vpop.permute.xlu1 %25  }
  0x79   :  { %16 = vst.msk [vmem:[#allocation0] sm:$0x1] %vm15_vm2, %v14_v10  }
  0x7a   :  { %22 = vst.msk [vmem:[#allocation0] sm:$0x1] %vm21_vm3, %v20_v9  }
  0x7b   :  { %28 = vst.msk [vmem:[#allocation0] sm:$0x1] %vm27_vm4, %v26_v11  }
  0x7c   :  { %v32_v12 = vpop.permute.xlu0 %31   ;;  %v38_v13 = vpop.permute.xlu1 %37  }
  0x7d   :  { %34 = vst.msk [vmem:[#allocation0] sm:$0x1] %vm33_vm5, %v32_v12  }
  0x7e   :  { %40 = vst.msk [vmem:[#allocation0] sm:$0x1] %vm39_vm6, %v38_v13  }
  0x80   :  { %v44_v14 = vpop.permute.xlu0 %43  }
  0x81   :  { %46 = vst.msk [vmem:[#allocation0] sm:$0x1] %vm45_vm7, %v44_v14  }
  0x88   :  { %v50_v15 = vld [vmem:[#allocation0] sm:$0x1] }
  0x89   :  { %52 = vst [vmem:[%s112_s1] sm:$0x1] %v50_v15 }

// kernel: tile.13
= control target key start
LH: loop header
LB: loop body
LE: loop exit
PB: predicated region body
PF: predicated region fallthrough
CT: control target
= control target key end

     0   :  { %s22_s0 = inlined_call_operand.vmem [shape: f32[16], index: 0, kind: input, shape index: {}]   ;;  %s23_s1 = inlined_call_operand.vmem [shape: f32[8,16], index: 1, kind: output, shape index: {}]  }
   0x1   :  { %v4_v0 = vld [vmem:[%s22_s0] ss:$0 sm:$0xff] }
   0x2   :  { %5 = vst [vmem:[%s23_s1] sm:$0xff] %v4_v0 }

// kernel: tile.18
= control target key start
LH: loop header
LB: loop body
LE: loop exit
PB: predicated region body
PF: predicated region fallthrough
CT: control target
= control target key end

     0   :  { %s22_s0 = inlined_call_operand.vmem [shape: f32[4], index: 0, kind: input, shape index: {}]   ;;  %s23_s1 = inlined_call_operand.vmem [shape: f32[4,4], index: 1, kind: output, shape index: {}]  }
   0x1   :  { %v4_v0 = vld [vmem:[%s22_s0] ss:$0 sm:$0xff] }
   0x2   :  { %5 = vst [vmem:[%s23_s1] sm:$0xf] %v4_v0 }

// kernel: tile.19
= control target key start
LH: loop header
LB: loop body
LE: loop exit
PB: predicated region body
PF: predicated region fallthrough
CT: control target
= control target key end

     0   :  { %vm7_vm0 = vcmask 31744   ;;  %s37_s8 = smov 4   ;;  %s38_s9 = smov 8   ;;  %vm13_vm1 = vcmask 130144   ;;  %vm19_vm2 = vcmask 97344   ;;  %vm25_vm3 = vcmask 64544   ;;  %s55_s0 = inlined_call_operand.vmem [shape: f32[4,4], index: 0, kind: input, shape index: {}]   ;;  %s56_s1 = inlined_call_operand.vmem [shape: f32[1,16], index: 1, kind: output, shape index: {}]  }
   0x1   :  { %v4_v0 = vld [vmem:[%s55_s0] sm:$0xf]  ;;  %s36_s0 = smov 12  }
   0x2   :  { %5 = vst [vmem:[#allocation1] sm:$0xf] %v4_v0 }
   0x9   :  { %v10_v1 = vld [vmem:[#allocation1 + $0x3] sm:$0x1]   ;;  %v22_v2 = vld [vmem:[#allocation1 + $0x1] sm:$0x1]   ;;  %v6_v3 = vld [vmem:[#allocation1] sm:$0x1]  }
   0xa   :  { %11 = vrot.lane.b32.xlu0 %v10_v1, %s36_s0  ;;  %23 = vrot.lane.b32.xlu1 %v22_v2, %s37_s8  ;;  %v16_v4 = vld [vmem:[#allocation1 + $0x2] sm:$0x1]   ;;  %8 = vst.msk [vmem:[#allocation0] sm:$0x1] %vm7_vm0, %v6_v3  }
   0xe   :  { %17 = vrot.lane.b32.xlu0 %v16_v4, %s38_s9 }
  0x7c   :  { %v12_v5 = vpop.permute.xlu0 %11   ;;  %v24_v6 = vpop.permute.xlu1 %23  }
  0x7d   :  { %14 = vst.msk [vmem:[#allocation0] sm:$0x1] %vm13_vm1, %v12_v5  }
  0x80   :  { %v18_v7 = vpop.permute.xlu0 %17  }
  0x81   :  { %20 = vst.msk [vmem:[#allocation0] sm:$0x1] %vm19_vm2, %v18_v7  }
  0x82   :  { %26 = vst.msk [vmem:[#allocation0] sm:$0x1] %vm25_vm3, %v24_v6  }
  0x89   :  { %v30_v8 = vld [vmem:[#allocation0] sm:$0x1] }
  0x8a   :  { %32 = vst [vmem:[%s56_s1] sm:$0x1] %v30_v8 }

// kernel: encoder_forward.1
= control target key start
LH: loop header
LB: loop body
LE: loop exit
PB: predicated region body
PF: predicated region fallthrough
CT: control target
= control target key end

     0   :  { %s3623_s24 = smov 0   ;;  %s3625_s25 = smov 0   ;;  %s4393_s0 = inlined_call_operand.vmem [shape: f32[16,16,16], index: 0, kind: input, shape index: {}]   ;;  %s4394_s1 = inlined_call_operand.vmem [shape: f32[3,16,128], index: 1, kind: input, shape index: {}]   ;;  %s4395_s2 = inlined_call_operand.vmem [shape: f32[3,16,128], index: 2, kind: input, shape index: {}]   ;;  %s4396_s3 = inlined_call_operand.vmem [shape: f32[1,128], index: 3, kind: input, shape index: {}]   ;;  %s4397_s4 = inlined_call_operand.vmem [shape: f32[3,128,16], index: 4, kind: input, shape index: {}]   ;;  %s4398_s5 = inlined_call_operand.vmem [shape: f32[3,128,16], index: 5, kind: input, shape index: {}]   ;;  %s4399_s6 = inlined_call_operand.vmem [shape: f32[1,16], index: 6, kind: input, shape index: {}]   ;;  %s4400_s7 = inlined_call_operand.vmem [shape: f32[4,16,16], index: 7, kind: output, shape index: {}]  }
   0x1   :  { %s3627_s26 = smov 0  }
   0x2 LB: > { %s2358_s27 = sadd.s32 4294967295, %s3580_s26   ;;  %s3640_s28 = sadd.s32 1, %s3580_s26   ;;  %s3580_s26 = sphi %s3627_s26, %s4404_s26   ;;  %s3576_s25 = sphi %s3625_s25, %s4403_s25   ;;  %s3572_s24 = sphi %s3623_s24, %s4402_s24  }
   0x3   : > { %s21_s29 = ssub.s32 %s3580_s26, %s3640_s28  ;;  %s24_s30 = sadd.s32 1, %s3576_s25 }
   0x4   : > { %p22_p0 = scmp.eq.s32.totalorder %s21_s29, 0  ;;  %p31_p1 = scmp.ne.s32.totalorder %s3576_s25, %s3572_s24 }
   0x5   : > { %p32_p2 = scmp.eq.s32.totalorder %s3580_s26, 0  ;;  %p187_p3 = scmp.eq.s32.totalorder %s2358_s27, 1 }
   0x6   : > { %s3651_s8 = scalar_select %p22_p0, %s3576_s25, %s24_s30  }
   0x7   : > { %p33_p4 = por %p32_p2, %p31_p1  ;;  %p3653_p5 = por %p187_p3, %p31_p1 }
   0x8   : > { %p2361_p6 = scmp.ge.s32.totalorder %s3580_s26, 2 }
   0xa   : > { %227 = sbr.rel (%p2361_p6) target bundleno = 29 (0x1d), region = 40 }
  0x11   : > { %230 = sbr.rel (!%p33_p4) target bundleno = 29 (0x1d), region = 44  ;;  %s232_s10 = sand.u32 (%p33_p4), 1, %s3576_s25  }
  0x12   : > { %s2363_s11 = sshll.u32 (%p33_p4), %s3580_s26, 3  ;;  %s2362_s12 = sshll.u32 (%p33_p4), %s232_s10, 7 }
  0x13   : > { %s3663_s15 = scalar_lea.vmem (%p33_p4), %s4393_s0, %s2363_s11  ;;  %s234_s16 = scalar_lea.vmem (%p33_p4), [#allocation2], %s2362_s12 }
  0x14   : > { %v294_v0 = vld [vmem:[%s3663_s15] sm:$0xff] (%p33_p4)  ;;  %v296_v1 = vld [vmem:[%s3663_s15 + $0x10] sm:$0xff] (%p33_p4) }
  0x15   : > { %v298_v2 = vld [vmem:[%s3663_s15 + $0x20] sm:$0xff] (%p33_p4)  ;;  %295 = vst [vmem:[%s234_s16] sm:$0xff] (%p33_p4), %v294_v0  ;;  %297 = vst [vmem:[%s234_s16 + $0x8] sm:$0xff] (%p33_p4), %v296_v1  ;;  %v300_v3 = vld [vmem:[%s3663_s15 + $0x30] sm:$0xff] (%p33_p4) }
  0x16   : > { %299 = vst [vmem:[%s234_s16 + $0x10] sm:$0xff] (%p33_p4), %v298_v2  ;;  %v302_v4 = vld [vmem:[%s3663_s15 + $0x40] sm:$0xff] (%p33_p4)  ;;  %v304_v5 = vld [vmem:[%s3663_s15 + $0x50] sm:$0xff] (%p33_p4)  ;;  %301 = vst [vmem:[%s234_s16 + $0x18] sm:$0xff] (%p33_p4), %v300_v3 }
  0x17   : > { %303 = vst [vmem:[%s234_s16 + $0x20] sm:$0xff] (%p33_p4), %v302_v4  ;;  %305 = vst [vmem:[%s234_s16 + $0x28] sm:$0xff] (%p33_p4), %v304_v5  ;;  %v306_v6 = vld [vmem:[%s3663_s15 + $0x60] sm:$0xff] (%p33_p4)  ;;  %v308_v7 = vld [vmem:[%s3663_s15 + $0x70] sm:$0xff] (%p33_p4) }
  0x18   : > { %v310_v8 = vld [vmem:[%s3663_s15 + $0x80] sm:$0xff]  ;;  %307 = vst [vmem:[%s234_s16 + $0x30] sm:$0xff] %v306_v6  ;;  %309 = vst [vmem:[%s234_s16 + $0x38] sm:$0xff] %v308_v7  ;;  %v312_v9 = vld [vmem:[%s3663_s15 + $0x90] sm:$0xff] }
  0x19   : > { %311 = vst [vmem:[%s234_s16 + $0x40] sm:$0xff] %v310_v8  ;;  %v314_v10 = vld [vmem:[%s3663_s15 + $0xa0] sm:$0xff]  ;;  %v316_v11 = vld [vmem:[%s3663_s15 + $0xb0] sm:$0xff]  ;;  %313 = vst [vmem:[%s234_s16 + $0x48] sm:$0xff] %v312_v9 }
  0x1a   : > { %315 = vst [vmem:[%s234_s16 + $0x50] sm:$0xff] %v314_v10  ;;  %317 = vst [vmem:[%s234_s16 + $0x58] sm:$0xff] %v316_v11  ;;  %v318_v12 = vld [vmem:[%s3663_s15 + $0xc0] sm:$0xff]  ;;  %v320_v13 = vld [vmem:[%s3663_s15 + $0xd0] sm:$0xff] }
  0x1b   : > { %v322_v14 = vld [vmem:[%s3663_s15 + $0xe0] sm:$0xff]  ;;  %319 = vst [vmem:[%s234_s16 + $0x60] sm:$0xff] %v318_v12  ;;  %321 = vst [vmem:[%s234_s16 + $0x68] sm:$0xff] %v320_v13  ;;  %v324_v15 = vld [vmem:[%s3663_s15 + $0xf0] sm:$0xff] }
  0x1c   : > { %323 = vst [vmem:[%s234_s16 + $0x70] sm:$0xff] %v322_v14  ;;  %325 = vst [vmem:[%s234_s16 + $0x78] sm:$0xff] %v324_v15 }
  0x1d PF: > { %p2364_p7 = scmp.ge.s32.totalorder %s3580_s26, 1  ;;  %p330_p8 = scmp.lt.s32.totalorder %s3580_s26, 3 }
  0x1f   : > { %p331_p9 = pnand %p2364_p7, %p330_p8 }
  0x20   : > { %v2367_v16 = vld [vmem:[%s4394_s1 + $0x10] sm:$0xff] (!%p331_p9)  ;;  %v2368_v17 = vld [vmem:[%s4394_s1 + $0x18] sm:$0xff] (!%p331_p9)  ;;  %s337_s23 = sand.u32 (!%p331_p9), 1, %s3572_s24   ;;  %v383_v21 = vld [vmem:[%s4394_s1] sm:$0xff] (!%p331_p9)  ;;  %vm388_vm0 = vcmask (!%p331_p9), 130048   ;;  %v3582_v52 = vmov (!%p331_p9), 0.0  }
  0x21   : > { %334 = sbr.rel (%p331_p9) target bundleno = 636 (0x27c), region = 82  ;;  %v2418_v18 = vld [vmem:[%s4395_s2 + $0x10] sm:$0xff] (!%p331_p9)  ;;  %v3221_v19 = vpack.c.bf16 (!%p331_p9), %v2368_v17, %v2367_v16  ;;  %v2419_v20 = vld [vmem:[%s4395_s2 + $0x18] sm:$0xff] (!%p331_p9)  ;;  %s2365_s10 = sshll.u32 (!%p331_p9), %s337_s23, 7  ;;  %v384_v22 = vld [vmem:[%s4394_s1 + $0x8] sm:$0xff] (!%p331_p9) }
  0x22   : > { %v3233_v23 = vpack.c.bf16 (!%p331_p9), %v2419_v20, %v2418_v18  ;;  %v3225_v24 = vpack.c.bf16 (!%p331_p9), %v384_v22, %v383_v21  ;;  %v933_v25 = vld [vmem:[%s4395_s2] sm:$0xff] (!%p331_p9)  ;;  %v934_v26 = vld [vmem:[%s4395_s2 + $0x8] sm:$0xff] (!%p331_p9)  ;;  %s3710_s19 = scalar_lea.vmem (!%p331_p9), [#allocation2], %s2365_s10  ;;  %v2470_v57 = vld [vmem:[%s4397_s4 + $0x90] sm:$0xff] (!%p331_p9)  ;;  %s2366_s14 = sshll.u32 (!%p331_p9), %s337_s23, 5 }
  0x23   : > { %3222 = vmatprep.subr.bf16.mxu0 (!%p331_p9), %v3221_v19  ;;  %v3713_v27 = vld [vmem:[%s3710_s19] sm:$0xff] (!%p331_p9)  ;;  %v3237_v28 = vpack.c.bf16 (!%p331_p9), %v934_v26, %v933_v25  ;;  %v3716_v29 = vld [vmem:[%s3710_s19 + $0x8] sm:$0xff] (!%p331_p9)  ;;  %v3723_v30 = vld [vmem:[%s3710_s19 + $0x10] sm:$0xff] (!%p331_p9)  ;;  %s4362_s24 = scalar_lea.vmem (!%p331_p9), [#allocation3], %s2366_s14 }
  0x24   : > { %3234 = vmatprep.subr.bf16.mxu1 (!%p331_p9), %v3233_v23  ;;  %3224 = vmatpush3.bf16.msra.mxu0 (!%p331_p9), %v3221_v19  ;;  %v2400_v31 = vld [vmem:[%s4394_s1 + $0x20] sm:$0xff] (!%p331_p9)  ;;  %v3733_v32 = vld [vmem:[%s3710_s19 + $0x18] sm:$0xff] (!%p331_p9)  ;;  %v2401_v33 = vld [vmem:[%s4394_s1 + $0x28] sm:$0xff] (!%p331_p9) }
  0x25   : > { %3236 = vmatpush3.bf16.msra.mxu1 (!%p331_p9), %v3233_v23  ;;  %2793 = vmatprep.mubr.msk.f32.mxu0 (!%p331_p9), %vm388_vm0, %v3713_v27  ;;  %v2451_v34 = vld [vmem:[%s4395_s2 + $0x20] sm:$0xff] (!%p331_p9)  ;;  %v3229_v36 = vpack.c.bf16 (!%p331_p9), %v2401_v33, %v2400_v31  ;;  %v2452_v37 = vld [vmem:[%s4395_s2 + $0x28] sm:$0xff] (!%p331_p9)  ;;  %v3763_v40 = vld [vmem:[%s3710_s19 + $0x30] sm:$0xff] (!%p331_p9) }
  0x26   : > { %2877 = vmatprep.mubr.msk.f32.mxu1 (!%p331_p9), %vm388_vm0, %v3713_v27  ;;  %3226 = vmatprep.subr.bf16.mxu0 (!%p331_p9), %v3225_v24  ;;  %v3744_v35 = vld [vmem:[%s3710_s19 + $0x20] sm:$0xff] (!%p331_p9)  ;;  %v3241_v38 = vpack.c.bf16 (!%p331_p9), %v2452_v37, %v2451_v34  ;;  %v3758_v39 = vld [vmem:[%s3710_s19 + $0x28] sm:$0xff] (!%p331_p9)  ;;  %v3772_v41 = vld [vmem:[%s3710_s19 + $0x38] sm:$0xff] (!%p331_p9) }
  0x27   : > { %2794 = vmatmul.mubr.msk.f32.vlgmr.msra.gmra.mrb[0].mxu0 (!%p331_p9), %vm388_vm0, %v3716_v29  ;;  %3238 = vmatprep.subr.bf16.mxu1 (!%p331_p9), %v3237_v28  ;;  %v3777_v42 = vld [vmem:[%s3710_s19 + $0x40] sm:$0xff] (!%p331_p9)  ;;  %v3786_v43 = vld [vmem:[%s3710_s19 + $0x48] sm:$0xff] (!%p331_p9)  ;;  %v3791_v44 = vld [vmem:[%s3710_s19 + $0x50] sm:$0xff] (!%p331_p9) }
  0x28   : > { %2878 = vmatmul.mubr.msk.f32.vlgmr.msra.gmra.mrb[0].mxu1 %vm388_vm0, %v3716_v29  ;;  %3228 = vmatpush3.bf16.msra.mxu0 %v3225_v24  ;;  %v3800_v45 = vld [vmem:[%s3710_s19 + $0x58] sm:$0xff]  ;;  %v3805_v46 = vld [vmem:[%s3710_s19 + $0x60] sm:$0xff]  ;;  %v3814_v47 = vld [vmem:[%s3710_s19 + $0x68] sm:$0xff]  ;;  %s2534_s23 = sshll.u32 (%p3653_p5), %s2358_s27, 3 }
  0x29   : > { %3240 = vmatpush3.bf16.msra.mxu1 %v3237_v28  ;;  %2796 = vmatprep.mubr.msk.f32.mxu0 %vm388_vm0, %v3723_v30  ;;  %v3819_v48 = vld [vmem:[%s3710_s19 + $0x70] sm:$0xff]  ;;  %v3828_v49 = vld [vmem:[%s3710_s19 + $0x78] sm:$0xff]  ;;  %v2468_v50 = vld [vmem:[%s4397_s4 + $0x80] sm:$0xff]  ;;  %s2257_s17 = scalar_lea.vmem (%p3653_p5), %s4400_s7, %s2534_s23 }
  0x2a   : > { %2880 = vmatprep.mubr.msk.f32.mxu1 %vm388_vm0, %v3723_v30  ;;  %3230 = vmatprep.subr.bf16.mxu0 %v3229_v36  ;;  %v2469_v51 = vld [vmem:[%s4397_s4 + $0x88] sm:$0xff]  ;;  %v2501_v53 = vld [vmem:[%s4398_s5 + $0x80] sm:$0xff]  ;;  %v2471_v58 = vld [vmem:[%s4397_s4 + $0x98] sm:$0xff] }
  0x2b   : > { %2797 = vmatmul.mubr.msk.f32.gmra.mrb[2].mxu0 %vm388_vm0, %v3733_v32  ;;  %3242 = vmatprep.subr.bf16.mxu1 %v3241_v38  ;;  %v2502_v54 = vld [vmem:[%s4398_s5 + $0x88] sm:$0xff]  ;;  %v3245_v55 = vpack.c.bf16 %v2469_v51, %v2468_v50  ;;  %v2503_v59 = vld [vmem:[%s4398_s5 + $0x90] sm:$0xff]  ;;  %v2504_v60 = vld [vmem:[%s4398_s5 + $0x98] sm:$0xff]  ;;  %v3249_v61 = vpack.c.bf16 %v2471_v58, %v2470_v57 }
  0x2c   : > { %2881 = vmatmul.mubr.msk.f32.gmra.mrb[2].mxu1 %vm388_vm0, %v3733_v32  ;;  %2799 = vmatprep.mubr.msk.f32.mxu0 %vm388_vm0, %v3744_v35  ;;  %v3341_v56 = vpack.c.bf16 %v2502_v54, %v2501_v53  ;;  %v3345_v62 = vpack.c.bf16 %v2504_v60, %v2503_v59  ;;  %v2472_v63 = vld [vmem:[%s4397_s4 + $0xa0] sm:$0xff]  ;;  %v2473_v0 = vld [vmem:[%s4397_s4 + $0xa8] sm:$0xff]  ;;  %v2474_v5 = vld [vmem:[%s4397_s4 + $0xb0] sm:$0xff] }
  0x2d   : > { %2883 = vmatprep.mubr.msk.f32.mxu1 %vm388_vm0, %v3744_v35  ;;  %v2505_v1 = vld [vmem:[%s4398_s5 + $0xa0] sm:$0xff]  ;;  %v2506_v2 = vld [vmem:[%s4398_s5 + $0xa8] sm:$0xff]  ;;  %v3253_v3 = vpack.c.bf16 %v2473_v0, %v2472_v63  ;;  %v2475_v6 = vld [vmem:[%s4397_s4 + $0xb8] sm:$0xff] }
  0x2e   : > { %v3349_v4 = vpack.c.bf16 %v2506_v2, %v2505_v1  ;;  %v2507_v7 = vld [vmem:[%s4398_s5 + $0xb0] sm:$0xff]  ;;  %v2508_v8 = vld [vmem:[%s4398_s5 + $0xb8] sm:$0xff]  ;;  %v3257_v9 = vpack.c.bf16 %v2475_v6, %v2474_v5  ;;  %v2476_v11 = vld [vmem:[%s4397_s4 + $0xc0] sm:$0xff] }
  0x2f   : > { %2800 = vmatmul.mubr.msk.f32.gmra.mrb[4].mxu0 %vm388_vm0, %v3758_v39  ;;  %v3353_v10 = vpack.c.bf16 %v2508_v8, %v2507_v7  ;;  %v2477_v12 = vld [vmem:[%s4397_s4 + $0xc8] sm:$0xff]  ;;  %v2509_v13 = vld [vmem:[%s4398_s5 + $0xc0] sm:$0xff]  ;;  %v2478_v17 = vld [vmem:[%s4397_s4 + $0xd0] sm:$0xff] }
  0x30   : > { %2884 = vmatmul.mubr.msk.f32.gmra.mrb[4].mxu1 %vm388_vm0, %v3758_v39  ;;  %2802 = vmatprep.mubr.msk.f32.mxu0 %vm388_vm0, %v3763_v40  ;;  %v2510_v14 = vld [vmem:[%s4398_s5 + $0xc8] sm:$0xff]  ;;  %v3261_v15 = vpack.c.bf16 %v2477_v12, %v2476_v11  ;;  %v2479_v18 = vld [vmem:[%s4397_s4 + $0xd8] sm:$0xff]  ;;  %v2511_v19 = vld [vmem:[%s4398_s5 + $0xd0] sm:$0xff] }
  0x31   : > { %2886 = vmatprep.mubr.msk.f32.mxu1 %vm388_vm0, %v3763_v40  ;;  %v3357_v16 = vpack.c.bf16 %v2510_v14, %v2509_v13  ;;  %v3265_v20 = vpack.c.bf16 %v2479_v18, %v2478_v17  ;;  %v2512_v21 = vld [vmem:[%s4398_s5 + $0xd8] sm:$0xff]  ;;  %v2480_v23 = vld [vmem:[%s4397_s4 + $0xe0] sm:$0xff]  ;;  %v2481_v24 = vld [vmem:[%s4397_s4 + $0xe8] sm:$0xff] }
  0x32   : > { %v3361_v22 = vpack.c.bf16 %v2512_v21, %v2511_v19  ;;  %v2513_v25 = vld [vmem:[%s4398_s5 + $0xe0] sm:$0xff]  ;;  %v3269_v26 = vpack.c.bf16 %v2481_v24, %v2480_v23  ;;  %v2515_v31 = vld [vmem:[%s4398_s5 + $0xf0] sm:$0xff]  ;;  %v2516_v33 = vld [vmem:[%s4398_s5 + $0xf8] sm:$0xff] }
  0x33   : > { %2803 = vmatmul.mubr.msk.f32.gmra.mrb[6].mxu0 %vm388_vm0, %v3772_v41  ;;  %v3369_v34 = vpack.c.bf16 %v2516_v33, %v2515_v31  ;;  %v1844_v37 = vld [vmem:[%s4398_s5] sm:$0xff]  ;;  %v1451_v11 = vld [vmem:[%s4397_s4 + $0x18] sm:$0xff] }
  0x34   : > { %2887 = vmatmul.mubr.msk.f32.gmra.mrb[6].mxu1 %vm388_vm0, %v3772_v41  ;;  %2805 = vmatprep.mubr.msk.f32.mxu0 %vm388_vm0, %v3777_v42  ;;  %v1847_v17 = vld [vmem:[%s4398_s5 + $0x18] sm:$0xff]  ;;  %v1452_v31 = vld [vmem:[%s4397_s4 + $0x20] sm:$0xff] }
  0x35   : > { %2889 = vmatprep.mubr.msk.f32.mxu1 %vm388_vm0, %v3777_v42 }
  0x37   : > { %2806 = vmatmul.mubr.msk.f32.gmra.mrb[8].mxu0 %vm388_vm0, %v3786_v43 }
  0x38   : > { %2890 = vmatmul.mubr.msk.f32.gmra.mrb[8].mxu1 %vm388_vm0, %v3786_v43  ;;  %2808 = vmatprep.mubr.msk.f32.mxu0 %vm388_vm0, %v3791_v44 }
  0x39   : > { %2892 = vmatprep.mubr.msk.f32.mxu1 %vm388_vm0, %v3791_v44 }
  0x3b   : > { %2809 = vmatmul.mubr.msk.f32.gmra.mrb[10].mxu0 %vm388_vm0, %v3800_v45 }
  0x3c   : > { %2893 = vmatmul.mubr.msk.f32.gmra.mrb[10].mxu1 %vm388_vm0, %v3800_v45  ;;  %2811 = vmatprep.mubr.msk.f32.mxu0 %vm388_vm0, %v3805_v46 }
  0x3d   : > { %2895 = vmatprep.mubr.msk.f32.mxu1 %vm388_vm0, %v3805_v46 }
  0x3f   : > { %2812 = vmatmul.mubr.msk.f32.gmra.mrb[12].mxu0 %vm388_vm0, %v3814_v47 }
  0x40   : > { %2896 = vmatmul.mubr.msk.f32.gmra.mrb[12].mxu1 %vm388_vm0, %v3814_v47  ;;  %2814 = vmatprep.mubr.msk.f32.mxu0 %vm388_vm0, %v3819_v48 }
  0x41   : > { %2898 = vmatprep.mubr.msk.f32.mxu1 %vm388_vm0, %v3819_v48 }
  0x43   : > { %2815 = vmatmul.mubr.msk.f32.gmra.mrb[14].mxu0 %vm388_vm0, %v3828_v49 }
  0x44   : > { %2899 = vmatmul.mubr.msk.f32.gmra.mrb[14].mxu1 %vm388_vm0, %v3828_v49  ;;  %2821 = vmatprep.mubr.f32.mxu0 %v3582_v52 }
  0x45   : > { %2905 = vmatprep.mubr.f32.mxu1 %v3582_v52 }
  0x47   : > { %2822 = vmatmul.mubr.msk.f32.vlgmr.msra.gmra.mrb[0].mxu0 %vm388_vm0, %v3713_v27 }
  0x48   : > { %2906 = vmatmul.mubr.msk.f32.vlgmr.msra.gmra.mrb[0].mxu1 %vm388_vm0, %v3713_v27  ;;  %3232 = vmatpush3.bf16.msra.mxu0 %v3229_v36  ;;  %v2514_v27 = vld [vmem:[%s4398_s5 + $0xe8] sm:$0xff] }
  0x49   : > { %3244 = vmatpush3.bf16.msra.mxu1 %v3241_v38  ;;  %2824 = vmatprep.mubr.msk.f32.mxu0 %vm388_vm0, %v3716_v29  ;;  %v3365_v28 = vpack.c.bf16 %v2514_v27, %v2513_v25  ;;  %v1449_v36 = vld [vmem:[%s4397_s4 + $0x8] sm:$0xff] }
  0x4a   : > { %2908 = vmatprep.mubr.msk.f32.mxu1 %vm388_vm0, %v3716_v29  ;;  %3246 = vmatprep.subr.bf16.mxu0 %v3245_v55 }
  0x4b   : > { %2825 = vmatmul.mubr.msk.f32.gmra.mrb[2].mxu0 %vm388_vm0, %v3723_v30  ;;  %3342 = vmatprep.subr.bf16.mxu1 %v3341_v56 }
  0x4c   : > { %2909 = vmatmul.mubr.msk.f32.gmra.mrb[2].mxu1 %vm388_vm0, %v3723_v30  ;;  %2827 = vmatprep.mubr.msk.f32.mxu0 %vm388_vm0, %v3733_v32 }
  0x4d   : > { %2911 = vmatprep.mubr.msk.f32.mxu1 %vm388_vm0, %v3733_v32 }
  0x4f   : > { %2828 = vmatmul.mubr.msk.f32.gmra.mrb[4].mxu0 %vm388_vm0, %v3744_v35 }
  0x50   : > { %2912 = vmatmul.mubr.msk.f32.gmra.mrb[4].mxu1 %vm388_vm0, %v3744_v35  ;;  %2830 = vmatprep.mubr.msk.f32.mxu0 %vm388_vm0, %v3758_v39 }
  0x51   : > { %2914 = vmatprep.mubr.msk.f32.mxu1 %vm388_vm0, %v3758_v39 }
  0x53   : > { %2831 = vmatmul.mubr.msk.f32.gmra.mrb[6].mxu0 %vm388_vm0, %v3763_v40 }
  0x54   : > { %2915 = vmatmul.mubr.msk.f32.gmra.mrb[6].mxu1 %vm388_vm0, %v3763_v40  ;;  %2833 = vmatprep.mubr.msk.f32.mxu0 %vm388_vm0, %v3772_v41 }
  0x55   : > { %2917 = vmatprep.mubr.msk.f32.mxu1 %vm388_vm0, %v3772_v41 }
  0x57   : > { %2834 = vmatmul.mubr.msk.f32.gmra.mrb[8].mxu0 %vm388_vm0, %v3777_v42 }
  0x58   : > { %2918 = vmatmul.mubr.msk.f32.gmra.mrb[8].mxu1 %vm388_vm0, %v3777_v42  ;;  %2836 = vmatprep.mubr.msk.f32.mxu0 %vm388_vm0, %v3786_v43 }
  0x59   : > { %2920 = vmatprep.mubr.msk.f32.mxu1 %vm388_vm0, %v3786_v43 }
  0x5b   : > { %2837 = vmatmul.mubr.msk.f32.gmra.mrb[10].mxu0 %vm388_vm0, %v3791_v44 }
  0x5c   : > { %2921 = vmatmul.mubr.msk.f32.gmra.mrb[10].mxu1 %vm388_vm0, %v3791_v44  ;;  %2839 = vmatprep.mubr.msk.f32.mxu0 %vm388_vm0, %v3800_v45 }
  0x5d   : > { %2923 = vmatprep.mubr.msk.f32.mxu1 %vm388_vm0, %v3800_v45 }
  0x5f   : > { %2840 = vmatmul.mubr.msk.f32.gmra.mrb[12].mxu0 %vm388_vm0, %v3805_v46 }
  0x60   : > { %2924 = vmatmul.mubr.msk.f32.gmra.mrb[12].mxu1 %vm388_vm0, %v3805_v46  ;;  %2842 = vmatprep.mubr.msk.f32.mxu0 %vm388_vm0, %v3814_v47 }
  0x61   : > { %2926 = vmatprep.mubr.msk.f32.mxu1 %vm388_vm0, %v3814_v47 }
  0x63   : > { %2843 = vmatmul.mubr.msk.f32.gmra.mrb[14].mxu0 %vm388_vm0, %v3819_v48 }
  0x64   : > { %2927 = vmatmul.mubr.msk.f32.gmra.mrb[14].mxu1 %vm388_vm0, %v3819_v48  ;;  %2849 = vmatprep.mubr.msk.f32.mxu0 %vm388_vm0, %v3716_v29 }
  0x65   : > { %2933 = vmatprep.mubr.msk.f32.mxu1 %vm388_vm0, %v3716_v29  ;;  %v2482_v29 = vld [vmem:[%s4397_s4 + $0xf0] sm:$0xff] }
  0x67   : > { %2850 = vmatmul.mubr.msk.f32.vlgmr.msra.gmra.mrb[0].mxu0 %vm388_vm0, %v3723_v30 }
  0x68   : > { %2934 = vmatmul.mubr.msk.f32.vlgmr.msra.gmra.mrb[0].mxu1 %vm388_vm0, %v3723_v30  ;;  %2852 = vmatprep.mubr.msk.f32.mxu0 %vm388_vm0, %v3733_v32  ;;  %v2483_v30 = vld [vmem:[%s4397_s4 + $0xf8] sm:$0xff] }
  0x69   : > { %2936 = vmatprep.mubr.msk.f32.mxu1 %vm388_vm0, %v3733_v32  ;;  %3248 = vmatpush3.bf16.msra.mxu0 %v3245_v55  ;;  %v3273_v32 = vpack.c.bf16 %v2483_v30, %v2482_v29 }
  0x6a   : > { %3344 = vmatpush3.bf16.msra.mxu1 %v3341_v56  ;;  %3250 = vmatprep.subr.bf16.mxu0 %v3249_v61 }
  0x6b   : > { %2853 = vmatmul.mubr.msk.f32.gmra.mrb[2].mxu0 %vm388_vm0, %v3744_v35  ;;  %3346 = vmatprep.subr.bf16.mxu1 %v3345_v62 }
  0x6c   : > { %2937 = vmatmul.mubr.msk.f32.gmra.mrb[2].mxu1 %vm388_vm0, %v3744_v35  ;;  %2855 = vmatprep.mubr.msk.f32.mxu0 %vm388_vm0, %v3758_v39  ;;  %v1448_v35 = vld [vmem:[%s4397_s4] sm:$0xff] }
  0x6d   : > { %2939 = vmatprep.mubr.msk.f32.mxu1 %vm388_vm0, %v3758_v39  ;;  %3252 = vmatpush3.bf16.msra.mxu0 %v3249_v61  ;;  %v4065_v38 = vpack.c.bf16 %v1449_v36, %v1448_v35  ;;  %v1845_v39 = vld [vmem:[%s4398_s5 + $0x8] sm:$0xff] }
  0x6e   : > { %3348 = vmatpush3.bf16.msra.mxu1 %v3345_v62  ;;  %3254 = vmatprep.subr.bf16.mxu0 %v3253_v3 }
  0x6f   : > { %2856 = vmatmul.mubr.msk.f32.gmra.mrb[4].mxu0 %vm388_vm0, %v3763_v40  ;;  %3350 = vmatprep.subr.bf16.mxu1 %v3349_v4 }
  0x70   : > { %2940 = vmatmul.mubr.msk.f32.gmra.mrb[4].mxu1 %vm388_vm0, %v3763_v40  ;;  %2858 = vmatprep.mubr.msk.f32.mxu0 %vm388_vm0, %v3772_v41  ;;  %v4070_v40 = vpack.c.bf16 %v1845_v39, %v1844_v37  ;;  %v1848_v37 = vld [vmem:[%s4398_s5 + $0x20] sm:$0xff]  ;;  %v1849_v39 = vld [vmem:[%s4398_s5 + $0x28] sm:$0xff] }
  0x71   : > { %2942 = vmatprep.mubr.msk.f32.mxu1 %vm388_vm0, %v3772_v41  ;;  %3256 = vmatpush3.bf16.msra.mxu0 %v3253_v3  ;;  %v4077_v41 = vld [vmem:[%s4396_s3] ss:$0 sm:$0xff] }
  0x72   : > { %3352 = vmatpush3.bf16.msra.mxu1 %v3349_v4  ;;  %3258 = vmatprep.subr.bf16.mxu0 %v3257_v9 }
  0x73   : > { %2859 = vmatmul.mubr.msk.f32.gmra.mrb[6].mxu0 %vm388_vm0, %v3777_v42  ;;  %3354 = vmatprep.subr.bf16.mxu1 %v3353_v10 }
  0x74   : > { %2943 = vmatmul.mubr.msk.f32.gmra.mrb[6].mxu1 %vm388_vm0, %v3777_v42  ;;  %2861 = vmatprep.mubr.msk.f32.mxu0 %vm388_vm0, %v3786_v43 }
  0x75   : > { %2945 = vmatprep.mubr.msk.f32.mxu1 %vm388_vm0, %v3786_v43  ;;  %3260 = vmatpush3.bf16.msra.mxu0 %v3257_v9 }
  0x76   : > { %3356 = vmatpush3.bf16.msra.mxu1 %v3353_v10  ;;  %3262 = vmatprep.subr.bf16.mxu0 %v3261_v15  ;;  %v1450_v10 = vld [vmem:[%s4397_s4 + $0x10] sm:$0xff] }
  0x77   : > { %2862 = vmatmul.mubr.msk.f32.gmra.mrb[8].mxu0 %vm388_vm0, %v3791_v44  ;;  %3358 = vmatprep.subr.bf16.mxu1 %v3357_v16  ;;  %v3281_v24 = vpack.c.bf16 %v1451_v11, %v1450_v10 }
  0x78   : > { %2946 = vmatmul.mubr.msk.f32.gmra.mrb[8].mxu1 %vm388_vm0, %v3791_v44  ;;  %2864 = vmatprep.mubr.msk.f32.mxu0 %vm388_vm0, %v3800_v45 }
  0x79   : > { %2948 = vmatprep.mubr.msk.f32.mxu1 %vm388_vm0, %v3800_v45  ;;  %3264 = vmatpush3.bf16.msra.mxu0 %v3261_v15 }
  0x7a   : > { %3360 = vmatpush3.bf16.msra.mxu1 %v3357_v16  ;;  %3266 = vmatprep.subr.bf16.mxu0 %v3265_v20  ;;  %v1846_v16 = vld [vmem:[%s4398_s5 + $0x10] sm:$0xff] }
  0x7b   : > { %2865 = vmatmul.mubr.msk.f32.gmra.mrb[10].mxu0 %vm388_vm0, %v3805_v46  ;;  %3362 = vmatprep.subr.bf16.mxu1 %v3361_v22  ;;  %v3377_v30 = vpack.c.bf16 %v1847_v17, %v1846_v16 }
  0x7c   : > { %2949 = vmatmul.mubr.msk.f32.gmra.mrb[10].mxu1 %vm388_vm0, %v3805_v46  ;;  %2867 = vmatprep.mubr.msk.f32.mxu0 %vm388_vm0, %v3814_v47 }
  0x7d   : > { %2951 = vmatprep.mubr.msk.f32.mxu1 %vm388_vm0, %v3814_v47  ;;  %3268 = vmatpush3.bf16.msra.mxu0 %v3265_v20 }
  0x7e   : > { %3364 = vmatpush3.bf16.msra.mxu1 %v3361_v22  ;;  %3270 = vmatprep.subr.bf16.mxu0 %v3269_v26 }
  0x7f   : > { %2868 = vmatmul.mubr.msk.f32.gmra.mrb[12].mxu0 %vm388_vm0, %v3819_v48  ;;  %3366 = vmatprep.subr.bf16.mxu1 %v3365_v28 }
  0x80   : > { %2952 = vmatmul.mubr.msk.f32.gmra.mrb[12].mxu1 %vm388_vm0, %v3819_v48  ;;  %2870 = vmatprep.mubr.msk.f32.mxu0 %vm388_vm0, %v3828_v49 }
  0x81   : > { %2954 = vmatprep.mubr.msk.f32.mxu1 %vm388_vm0, %v3828_v49  ;;  %3272 = vmatpush3.bf16.msra.mxu0 %v3269_v26 }
  0x82   : > { %3368 = vmatpush3.bf16.msra.mxu1 %v3365_v28  ;;  %3274 = vmatprep.subr.bf16.mxu0 %v3273_v32 }
  0x83   : > { %2871 = vmatmul.mubr.f32.gmra.mrb[14].mxu0 %v3582_v52  ;;  %3370 = vmatprep.subr.bf16.mxu1 %v3369_v34 }
  0x84   : > { %2955 = vmatmul.mubr.f32.gmra.mrb[14].mxu1 %v3582_v52 }
  0x85   : > { %3276 = vmatpush3.bf16.msra.mxu0 %v3273_v32  ;;  %v1453_v32 = vld [vmem:[%s4397_s4 + $0x28] sm:$0xff] }
  0x86   : > { %3372 = vmatpush3.bf16.msra.mxu1 %v3369_v34  ;;  %3278 = vmatprep.subr.bf16.mxu0 %v4065_v38 }
  0x87   : > { %3374 = vmatprep.subr.bf16.mxu1 %v4070_v40 }
 0x13a   : > { %v2851_v42 = vpop.f32.mrb[0].mxu0 }
 0x13b   : > { %v902_v43 = vadd.f32 %v2851_v42, %v4077_v41  ;;  %v2935_v44 = vpop.f32.mrb[0].mxu1  ;;  %v799_v45 = vpop.f32.mrb[1].mxu0 }
 0x13c   : > { %v1393_v46 = vadd.f32 %v2935_v44, %v4077_v41  ;;  %v901_v47 = vadd.f32 %v4077_v41, %v799_v45  ;;  %v1297_v48 = vpop.f32.mrb[1].mxu1 }
 0x13d   : > { %v918_v49 = vmax.f32 %v902_v43, 0.0  ;;  %v1392_v50 = vadd.f32 %v4077_v41, %v1297_v48  ;;  %v3285_v48 = vpack.c.bf16 %v1453_v32, %v1452_v31 }
 0x13e   : > { %v1409_v51 = vmax.f32 %v1393_v46, 0.0  ;;  %v917_v53 = vmax.f32 %v901_v47, 0.0  ;;  %v2854_v54 = vpop.f32.mrb[2].mxu0 }
 0x13f   : > { %v1408_v55 = vmax.f32 %v1392_v50, 0.0  ;;  %v904_v56 = vadd.f32 %v2854_v54, %v4077_v41  ;;  %v2938_v57 = vpop.f32.mrb[2].mxu1  ;;  %v809_v58 = vpop.f32.mrb[3].mxu0 }
 0x140   : > { %v1425_v59 = vmax.f32 %v918_v49, %v1409_v51  ;;  %v1395_v60 = vadd.f32 %v2938_v57, %v4077_v41  ;;  %v903_v61 = vadd.f32 %v4077_v41, %v809_v58  ;;  %v1307_v62 = vpop.f32.mrb[3].mxu1 }
 0x141   : > { %v1424_v63 = vmax.f32 %v917_v53, %v1408_v55  ;;  %v920_v0 = vmax.f32 %v904_v56, 0.0  ;;  %v1394_v1 = vadd.f32 %v4077_v41, %v1307_v62  ;;  %v3381_v55 = vpack.c.bf16 %v1849_v39, %v1848_v37  ;;  %v1454_v56 = vld [vmem:[%s4397_s4 + $0x30] sm:$0xff] }
 0x142   : > { %v1411_v2 = vmax.f32 %v1395_v60, 0.0  ;;  %v919_v3 = vmax.f32 %v903_v61, 0.0  ;;  %v2857_v4 = vpop.f32.mrb[4].mxu0  ;;  %v1850_v60 = vld [vmem:[%s4398_s5 + $0x30] sm:$0xff]  ;;  %v1851_v61 = vld [vmem:[%s4398_s5 + $0x38] sm:$0xff] }
 0x143   : > { %v4087_v5 = vmax.f32 %v1424_v63, %v1425_v59  ;;  %v1410_v6 = vmax.f32 %v1394_v1, 0.0  ;;  %v906_v7 = vadd.f32 %v2857_v4, %v4077_v41  ;;  %v2941_v8 = vpop.f32.mrb[4].mxu1  ;;  %v819_v9 = vpop.f32.mrb[5].mxu0  ;;  %v3385_v11 = vpack.c.bf16 %v1851_v61, %v1850_v60 }
 0x144   : > { %v1427_v12 = vmax.f32 %v920_v0, %v1411_v2  ;;  %v1397_v13 = vadd.f32 %v2941_v8, %v4077_v41  ;;  %v905_v14 = vadd.f32 %v4077_v41, %v819_v9  ;;  %v1317_v15 = vpop.f32.mrb[5].mxu1 }
 0x145   : > { %v1426_v18 = vmax.f32 %v919_v3, %v1410_v6  ;;  %v922_v19 = vmax.f32 %v906_v7, 0.0  ;;  %v1396_v20 = vadd.f32 %v4077_v41, %v1317_v15  ;;  %2989 = vmatprep.mubr.f32.mxu0 %v4087_v5  ;;  %3121 = vmatprep.mubr.f32.mxu1 %v4087_v5 }
 0x146   : > { %v1413_v21 = vmax.f32 %v1397_v13, 0.0  ;;  %v921_v22 = vmax.f32 %v905_v14, 0.0  ;;  %v2860_v23 = vpop.f32.mrb[6].mxu0  ;;  %v1457_v13 = vld [vmem:[%s4397_s4 + $0x48] sm:$0xff] }
 0x147   : > { %v4107_v25 = vmax.f32 %v1426_v18, %v1427_v12  ;;  %v1412_v26 = vmax.f32 %v1396_v20, 0.0  ;;  %v908_v27 = vadd.f32 %v2860_v23, %v4077_v41  ;;  %v2944_v28 = vpop.f32.mrb[6].mxu1  ;;  %v829_v29 = vpop.f32.mrb[7].mxu0  ;;  %v1456_v12 = vld [vmem:[%s4397_s4 + $0x40] sm:$0xff] }
 0x148   : > { %v1429_v33 = vmax.f32 %v922_v19, %v1413_v21  ;;  %v1399_v34 = vadd.f32 %v2944_v28, %v4077_v41  ;;  %v907_v35 = vadd.f32 %v4077_v41, %v829_v29  ;;  %v1327_v36 = vpop.f32.mrb[7].mxu1  ;;  %v1852_v18 = vld [vmem:[%s4398_s5 + $0x40] sm:$0xff]  ;;  %v1853_v19 = vld [vmem:[%s4398_s5 + $0x48] sm:$0xff] }
 0x149   : > { %v1428_v42 = vmax.f32 %v921_v22, %v1412_v26  ;;  %v924_v43 = vmax.f32 %v908_v27, 0.0  ;;  %v1398_v44 = vadd.f32 %v4077_v41, %v1327_v36  ;;  %2990 = vmatmul.mubr.f32.vlgmr.msra.gmra.mrb[16].mxu0 %v4107_v25  ;;  %3122 = vmatmul.mubr.f32.vlgmr.msra.gmra.mrb[16].mxu1 %v4107_v25  ;;  %v3293_v27 = vpack.c.bf16 %v1457_v13, %v1456_v12  ;;  %v1462_v13 = vld [vmem:[%s4397_s4 + $0x70] sm:$0xff] }
 0x14a   : > { %v1415_v45 = vmax.f32 %v1399_v34, 0.0  ;;  %v923_v46 = vmax.f32 %v907_v35, 0.0  ;;  %3280 = vmatpush3.bf16.msra.mxu0 %v4065_v38  ;;  %3376 = vmatpush3.bf16.msra.mxu1 %v4070_v40  ;;  %v2863_v47 = vpop.f32.mrb[8].mxu0  ;;  %v1455_v38 = vld [vmem:[%s4397_s4 + $0x38] sm:$0xff]  ;;  %v1458_v34 = vld [vmem:[%s4397_s4 + $0x50] sm:$0xff] }
 0x14b   : > { %v4129_v49 = vmax.f32 %v1428_v42, %v1429_v33  ;;  %v1414_v50 = vmax.f32 %v1398_v44, 0.0  ;;  %v910_v51 = vadd.f32 %v2863_v47, %v4077_v41  ;;  %v2947_v53 = vpop.f32.mrb[8].mxu1  ;;  %v839_v54 = vpop.f32.mrb[9].mxu0  ;;  %3282 = vmatprep.subr.bf16.mxu0 %v3281_v24  ;;  %3378 = vmatprep.subr.bf16.mxu1 %v3377_v30  ;;  %v3289_v4 = vpack.c.bf16 %v1455_v38, %v1454_v56  ;;  %v1459_v35 = vld [vmem:[%s4397_s4 + $0x58] sm:$0xff] }
 0x14c   : > { %v1431_v40 = vmax.f32 %v924_v43, %v1415_v45  ;;  %v1401_v57 = vadd.f32 %v2947_v53, %v4077_v41  ;;  %v909_v58 = vadd.f32 %v4077_v41, %v839_v54  ;;  %v1337_v59 = vpop.f32.mrb[9].mxu1  ;;  %v3389_v33 = vpack.c.bf16 %v1853_v19, %v1852_v18  ;;  %v1854_v43 = vld [vmem:[%s4398_s5 + $0x50] sm:$0xff]  ;;  %v1855_v44 = vld [vmem:[%s4398_s5 + $0x58] sm:$0xff] }
 0x14d   : > { %v1430_v62 = vmax.f32 %v923_v46, %v1414_v50  ;;  %v926_v63 = vmax.f32 %v910_v51, 0.0  ;;  %v1400_v0 = vadd.f32 %v4077_v41, %v1337_v59  ;;  %2992 = vmatprep.mubr.f32.mxu0 %v4129_v49  ;;  %3124 = vmatprep.mubr.f32.mxu1 %v4129_v49  ;;  %v3297_v53 = vpack.c.bf16 %v1459_v35, %v1458_v34  ;;  %v2488_v35 = vld [vmem:[%s4397_s4 + $0x120] sm:$0xff] }
 0x14e   : > { %v1417_v1 = vmax.f32 %v1401_v57, 0.0  ;;  %v925_v2 = vmax.f32 %v909_v58, 0.0  ;;  %3284 = vmatpush3.bf16.msra.mxu0 %v3281_v24  ;;  %3380 = vmatpush3.bf16.msra.mxu1 %v3377_v30  ;;  %v2866_v3 = vpop.f32.mrb[10].mxu0  ;;  %v3393_v57 = vpack.c.bf16 %v1855_v44, %v1854_v43  ;;  %v1460_v58 = vld [vmem:[%s4397_s4 + $0x60] sm:$0xff]  ;;  %v2490_v43 = vld [vmem:[%s4397_s4 + $0x130] sm:$0xff]  ;;  %v2491_v44 = vld [vmem:[%s4397_s4 + $0x138] sm:$0xff] }
 0x14f   : > { %v4149_v6 = vmax.f32 %v1430_v62, %v1431_v40  ;;  %v1416_v7 = vmax.f32 %v1400_v0, 0.0  ;;  %v912_v8 = vadd.f32 %v2866_v3, %v4077_v41  ;;  %v2950_v9 = vpop.f32.mrb[10].mxu1  ;;  %v849_v10 = vpop.f32.mrb[11].mxu0  ;;  %3286 = vmatprep.subr.bf16.mxu0 %v3285_v48  ;;  %3382 = vmatprep.subr.bf16.mxu1 %v3381_v55  ;;  %v1856_v0 = vld [vmem:[%s4398_s5 + $0x60] sm:$0xff] }
 0x150   : > { %v1433_v14 = vmax.f32 %v926_v63, %v1417_v1  ;;  %v1403_v15 = vadd.f32 %v2950_v9, %v4077_v41  ;;  %v911_v16 = vadd.f32 %v4077_v41, %v849_v10  ;;  %v1347_v17 = vpop.f32.mrb[11].mxu1  ;;  %v1461_v63 = vld [vmem:[%s4397_s4 + $0x68] sm:$0xff] }
 0x151   : > { %v1432_v20 = vmax.f32 %v925_v2, %v1416_v7  ;;  %v928_v21 = vmax.f32 %v912_v8, 0.0  ;;  %v1402_v22 = vadd.f32 %v4077_v41, %v1347_v17  ;;  %2993 = vmatmul.mubr.f32.gmra.mrb[18].mxu0 %v4149_v6  ;;  %3125 = vmatmul.mubr.f32.gmra.mrb[18].mxu1 %v4149_v6  ;;  %v1857_v1 = vld [vmem:[%s4398_s5 + $0x68] sm:$0xff] }
 0x152   : > { %v1419_v23 = vmax.f32 %v1403_v15, 0.0  ;;  %v927_v24 = vmax.f32 %v911_v16, 0.0  ;;  %3288 = vmatpush3.bf16.msra.mxu0 %v3285_v48  ;;  %3384 = vmatpush3.bf16.msra.mxu1 %v3381_v55  ;;  %v2869_v26 = vpop.f32.mrb[12].mxu0  ;;  %v3397_v12 = vpack.c.bf16 %v1857_v1, %v1856_v0  ;;  %v1858_v15 = vld [vmem:[%s4398_s5 + $0x70] sm:$0xff]  ;;  %v1859_v16 = vld [vmem:[%s4398_s5 + $0x78] sm:$0xff]  ;;  %v2529_v0 = vld [vmem:[%s4398_s5 + $0x160] sm:$0xff] }
 0x153   : > { %v4169_v28 = vmax.f32 %v1432_v20, %v1433_v14  ;;  %v1418_v29 = vmax.f32 %v1402_v22, 0.0  ;;  %v914_v30 = vadd.f32 %v2869_v26, %v4077_v41  ;;  %v2953_v31 = vpop.f32.mrb[12].mxu1  ;;  %v859_v32 = vpop.f32.mrb[13].mxu0  ;;  %3290 = vmatprep.subr.bf16.mxu0 %v3289_v4  ;;  %3386 = vmatprep.subr.bf16.mxu1 %v3385_v11  ;;  %v1463_v14 = vld [vmem:[%s4397_s4 + $0x78] sm:$0xff]  ;;  %v3401_v20 = vpack.c.bf16 %v1859_v16, %v1858_v15  ;;  %v2485_v22 = vld [vmem:[%s4397_s4 + $0x108] sm:$0xff] }
 0x154   : > { %v1435_v36 = vmax.f32 %v928_v21, %v1419_v23  ;;  %v1405_v37 = vadd.f32 %v2953_v31, %v4077_v41  ;;  %v913_v39 = vadd.f32 %v4077_v41, %v859_v32  ;;  %v1357_v42 = vpop.f32.mrb[13].mxu1  ;;  %v3305_v19 = vpack.c.bf16 %v1463_v14, %v1462_v13  ;;  %v2484_v21 = vld [vmem:[%s4397_s4 + $0x100] sm:$0xff]  ;;  %v2519_v31 = vld [vmem:[%s4398_s5 + $0x110] sm:$0xff]  ;;  %v2520_v32 = vld [vmem:[%s4398_s5 + $0x118] sm:$0xff] }
 0x155   : > { %v1434_v45 = vmax.f32 %v927_v24, %v1418_v29  ;;  %v930_v46 = vmax.f32 %v914_v30, 0.0  ;;  %v1404_v47 = vadd.f32 %v4077_v41, %v1357_v42  ;;  %2995 = vmatprep.mubr.f32.mxu0 %v4169_v28  ;;  %3127 = vmatprep.mubr.f32.mxu1 %v4169_v28  ;;  %v2517_v23 = vld [vmem:[%s4398_s5 + $0x100] sm:$0xff]  ;;  %v2518_v24 = vld [vmem:[%s4398_s5 + $0x108] sm:$0xff]  ;;  %v3309_v26 = vpack.c.bf16 %v2485_v22, %v2484_v21  ;;  %v2486_v29 = vld [vmem:[%s4397_s4 + $0x110] sm:$0xff] }
 0x156   : > { %v1421_v48 = vmax.f32 %v1405_v37, 0.0  ;;  %v929_v50 = vmax.f32 %v913_v39, 0.0  ;;  %3292 = vmatpush3.bf16.msra.mxu0 %v3289_v4  ;;  %3388 = vmatpush3.bf16.msra.mxu1 %v3385_v11  ;;  %v2872_v51 = vpop.f32.mrb[14].mxu0  ;;  %v3301_v11 = vpack.c.bf16 %v1461_v63, %v1460_v58  ;;  %v2487_v30 = vld [vmem:[%s4397_s4 + $0x118] sm:$0xff]  ;;  %v3409_v34 = vpack.c.bf16 %v2520_v32, %v2519_v31  ;;  %v2521_v37 = vld [vmem:[%s4398_s5 + $0x120] sm:$0xff]  ;;  %v2522_v39 = vld [vmem:[%s4398_s5 + $0x128] sm:$0xff] }
 0x157   : > { %v4189_v54 = vmax.f32 %v1434_v45, %v1435_v36  ;;  %v1420_v55 = vmax.f32 %v1404_v47, 0.0  ;;  %v916_v56 = vadd.f32 %v2872_v51, %v4077_v41  ;;  %v2956_v38 = vpop.f32.mrb[14].mxu1  ;;  %v869_v40 = vpop.f32.mrb[15].mxu0  ;;  %3294 = vmatprep.subr.bf16.mxu0 %v3293_v27  ;;  %3390 = vmatprep.subr.bf16.mxu1 %v3389_v33  ;;  %v2489_v36 = vld [vmem:[%s4397_s4 + $0x128] sm:$0xff]  ;;  %v3413_v42 = vpack.c.bf16 %v2522_v39, %v2521_v37  ;;  %v2523_v45 = vld [vmem:[%s4398_s5 + $0x130] sm:$0xff] }
 0x158   : > { %v1437_v59 = vmax.f32 %v930_v46, %v1421_v48  ;;  %v1407_v60 = vadd.f32 %v2956_v38, %v4077_v41  ;;  %v915_v61 = vadd.f32 %v4077_v41, %v869_v40  ;;  %v1367_v62 = vpop.f32.mrb[15].mxu1  ;;  %v2524_v46 = vld [vmem:[%s4398_s5 + $0x138] sm:$0xff]  ;;  %v3321_v47 = vpack.c.bf16 %v2491_v44, %v2490_v43  ;;  %v2493_v51 = vld [vmem:[%s4397_s4 + $0x148] sm:$0xff]  ;;  %v2494_v40 = vld [vmem:[%s4397_s4 + $0x150] sm:$0xff] }
 0x159   : > { %v1436_v2 = vmax.f32 %v929_v50, %v1420_v55  ;;  %v932_v3 = vmax.f32 %v916_v56, 0.0  ;;  %v1406_v4 = vadd.f32 %v4077_v41, %v1367_v62  ;;  %2996 = vmatmul.mubr.f32.gmra.mrb[20].mxu0 %v4189_v54  ;;  %3128 = vmatmul.mubr.f32.gmra.mrb[20].mxu1 %v4189_v54  ;;  %v3417_v48 = vpack.c.bf16 %v2524_v46, %v2523_v45  ;;  %v2492_v50 = vld [vmem:[%s4397_s4 + $0x140] sm:$0xff]  ;;  %v2526_v55 = vld [vmem:[%s4398_s5 + $0x148] sm:$0xff]  ;;  %v2527_v58 = vld [vmem:[%s4398_s5 + $0x150] sm:$0xff] }
 0x15a   : > { %v1423_v7 = vmax.f32 %v1407_v60, 0.0  ;;  %v931_v8 = vmax.f32 %v915_v61, 0.0  ;;  %3296 = vmatpush3.bf16.msra.mxu0 %v3293_v27  ;;  %3392 = vmatpush3.bf16.msra.mxu1 %v3389_v33  ;;  %v3405_v27 = vpack.c.bf16 %v2518_v24, %v2517_v23  ;;  %v3313_v33 = vpack.c.bf16 %v2487_v30, %v2486_v29  ;;  %v2496_v62 = vld [vmem:[%s4397_s4 + $0x160] sm:$0xff]  ;;  %v2497_v63 = vld [vmem:[%s4397_s4 + $0x168] sm:$0xff] }
 0x15b   : > { %v4209_v9 = vmax.f32 %v1436_v2, %v1437_v59  ;;  %v1422_v10 = vmax.f32 %v1406_v4, 0.0  ;;  %3298 = vmatprep.subr.bf16.mxu0 %v3297_v53  ;;  %3394 = vmatprep.subr.bf16.mxu1 %v3393_v57  ;;  %v3325_v56 = vpack.c.bf16 %v2493_v51, %v2492_v50  ;;  %v2528_v59 = vld [vmem:[%s4398_s5 + $0x158] sm:$0xff]  ;;  %v3333_v1 = vpack.c.bf16 %v2497_v63, %v2496_v62 }
 0x15c   : > { %v1439_v41 = vmax.f32 %v932_v3, %v1423_v7  ;;  %v3425_v61 = vpack.c.bf16 %v2528_v59, %v2527_v58  ;;  %v2498_v3 = vld [vmem:[%s4397_s4 + $0x170] sm:$0xff]  ;;  %v2499_v4 = vld [vmem:[%s4397_s4 + $0x178] sm:$0xff] }
 0x15d   : > { %v1438_v17 = vmax.f32 %v931_v8, %v1422_v10  ;;  %2998 = vmatprep.mubr.f32.mxu0 %v4209_v9  ;;  %3130 = vmatprep.mubr.f32.mxu1 %v4209_v9  ;;  %v2531_v7 = vld [vmem:[%s4398_s5 + $0x170] sm:$0xff]  ;;  %v2532_v8 = vld [vmem:[%s4398_s5 + $0x178] sm:$0xff]  ;;  %v3337_v10 = vpack.c.bf16 %v2499_v4, %v2498_v3 }
 0x15e   : > { %3300 = vmatpush3.bf16.msra.mxu0 %v3297_v53  ;;  %3396 = vmatpush3.bf16.msra.mxu1 %v3393_v57  ;;  %v2525_v53 = vld [vmem:[%s4398_s5 + $0x140] sm:$0xff]  ;;  %v2495_v57 = vld [vmem:[%s4397_s4 + $0x158] sm:$0xff] }
 0x15f   : > { %v4225_v18 = vmax.f32 %v1438_v17, %v1439_v41  ;;  %3302 = vmatprep.subr.bf16.mxu0 %v3301_v11  ;;  %3398 = vmatprep.subr.bf16.mxu1 %v3397_v12  ;;  %v3421_v38 = vpack.c.bf16 %v2526_v55, %v2525_v53  ;;  %v3329_v60 = vpack.c.bf16 %v2495_v57, %v2494_v40 }
 0x161   : > { %2999 = vmatmul.mubr.f32.gmra.mrb[22].mxu0 %v4225_v18  ;;  %3131 = vmatmul.mubr.f32.gmra.mrb[22].mxu1 %v4225_v18 }
 0x162   : > { %3304 = vmatpush3.bf16.msra.mxu0 %v3301_v11  ;;  %3400 = vmatpush3.bf16.msra.mxu1 %v3397_v12  ;;  %v3433_v11 = vpack.c.bf16 %v2532_v8, %v2531_v7 }
 0x163   : > { %3306 = vmatprep.subr.bf16.mxu0 %v3305_v19  ;;  %3402 = vmatprep.subr.bf16.mxu1 %v3401_v20 }
 0x164   : > { %3033 = vmatprep.mubr.f32.mxu0 %v3582_v52  ;;  %3165 = vmatprep.mubr.f32.mxu1 %v3582_v52 }
 0x166   : > { %3308 = vmatpush3.bf16.msra.mxu0 %v3305_v19  ;;  %3404 = vmatpush3.bf16.msra.mxu1 %v3401_v20 }
 0x167   : > { %3310 = vmatprep.subr.bf16.mxu0 %v3309_v26  ;;  %3406 = vmatprep.subr.bf16.mxu1 %v3405_v27 }
 0x169   : > { %3034 = vmatmul.mubr.f32.vlgmr.msra.gmra.mrb[16].mxu0 %v4087_v5  ;;  %3166 = vmatmul.mubr.f32.vlgmr.msra.gmra.mrb[16].mxu1 %v4087_v5  ;;  %v3317_v5 = vpack.c.bf16 %v2489_v36, %v2488_v35 }
 0x16a   : > { %3036 = vmatprep.mubr.f32.mxu0 %v4107_v25  ;;  %3312 = vmatpush3.bf16.msra.mxu0 %v3309_v26 }
 0x16b   : > { %3168 = vmatprep.mubr.f32.mxu1 %v4107_v25  ;;  %3408 = vmatpush3.bf16.msra.mxu1 %v3405_v27 }
 0x16c   : > { %3314 = vmatprep.subr.bf16.mxu0 %v3313_v33  ;;  %3410 = vmatprep.subr.bf16.mxu1 %v3409_v34 }
 0x16d   : > { %3037 = vmatmul.mubr.f32.gmra.mrb[18].mxu0 %v4129_v49  ;;  %3169 = vmatmul.mubr.f32.gmra.mrb[18].mxu1 %v4129_v49 }
 0x16e   : > { %3039 = vmatprep.mubr.f32.mxu0 %v4149_v6  ;;  %3316 = vmatpush3.bf16.msra.mxu0 %v3313_v33 }
 0x16f   : > { %3171 = vmatprep.mubr.f32.mxu1 %v4149_v6  ;;  %3412 = vmatpush3.bf16.msra.mxu1 %v3409_v34 }
 0x170   : > { %3318 = vmatprep.subr.bf16.mxu0 %v3317_v5  ;;  %3414 = vmatprep.subr.bf16.mxu1 %v3413_v42 }
 0x171   : > { %3040 = vmatmul.mubr.f32.gmra.mrb[20].mxu0 %v4169_v28  ;;  %3172 = vmatmul.mubr.f32.gmra.mrb[20].mxu1 %v4169_v28 }
 0x172   : > { %3042 = vmatprep.mubr.f32.mxu0 %v4189_v54  ;;  %3320 = vmatpush3.bf16.msra.mxu0 %v3317_v5 }
 0x173   : > { %3174 = vmatprep.mubr.f32.mxu1 %v4189_v54  ;;  %3416 = vmatpush3.bf16.msra.mxu1 %v3413_v42 }
 0x174   : > { %3322 = vmatprep.subr.bf16.mxu0 %v3321_v47  ;;  %3418 = vmatprep.subr.bf16.mxu1 %v3417_v48 }
 0x175   : > { %3043 = vmatmul.mubr.f32.gmra.mrb[22].mxu0 %v4209_v9  ;;  %3175 = vmatmul.mubr.f32.gmra.mrb[22].mxu1 %v4209_v9 }
 0x176   : > { %3324 = vmatpush3.bf16.msra.mxu0 %v3321_v47  ;;  %3077 = vmatprep.mubr.f32.mxu0 %v4107_v25 }
 0x177   : > { %3420 = vmatpush3.bf16.msra.mxu1 %v3417_v48  ;;  %3209 = vmatprep.mubr.f32.mxu1 %v4107_v25  ;;  %v2530_v25 = vld [vmem:[%s4398_s5 + $0x168] sm:$0xff] }
 0x178   : > { %3326 = vmatprep.subr.bf16.mxu0 %v3325_v56  ;;  %3422 = vmatprep.subr.bf16.mxu1 %v3421_v38  ;;  %v3429_v2 = vpack.c.bf16 %v2530_v25, %v2529_v0 }
 0x17a   : > { %3328 = vmatpush3.bf16.msra.mxu0 %v3325_v56 }
 0x17b   : > { %3424 = vmatpush3.bf16.msra.mxu1 %v3421_v38  ;;  %3330 = vmatprep.subr.bf16.mxu0 %v3329_v60 }
 0x17c   : > { %3426 = vmatprep.subr.bf16.mxu1 %v3425_v61 }
 0x17e   : > { %3332 = vmatpush3.bf16.msra.mxu0 %v3329_v60 }
 0x17f   : > { %3428 = vmatpush3.bf16.msra.mxu1 %v3425_v61  ;;  %3334 = vmatprep.subr.bf16.mxu0 %v3333_v1 }
 0x180   : > { %3430 = vmatprep.subr.bf16.mxu1 %v3429_v2 }
 0x182   : > { %3336 = vmatpush3.bf16.msra.mxu0 %v3333_v1 }
 0x183   : > { %3432 = vmatpush3.bf16.msra.mxu1 %v3429_v2  ;;  %3338 = vmatprep.subr.bf16.mxu0 %v3337_v10 }
 0x184   : > { %3434 = vmatprep.subr.bf16.mxu1 %v3433_v11 }
 0x186   : > { %3340 = vmatpush3.bf16.msra.mxu0 %v3337_v10 }
 0x187   : > { %3436 = vmatpush3.bf16.msra.mxu1 %v3433_v11 }
 0x189   : > { %3078 = vmatmul.mubr.f32.vlgmr.msra.gmra.mrb[16].mxu0 %v4129_v49 }
 0x18a   : > { %3210 = vmatmul.mubr.f32.vlgmr.msra.gmra.mrb[16].mxu1 %v4129_v49  ;;  %3080 = vmatprep.mubr.f32.mxu0 %v4149_v6  ;;  %v2500_v49 = vld [vmem:[%s4399_s6] ss:$0 sm:$0xff] }
 0x18b   : > { %3212 = vmatprep.mubr.f32.mxu1 %v4149_v6 }
 0x18d   : > { %3081 = vmatmul.mubr.f32.gmra.mrb[18].mxu0 %v4169_v28 }
 0x18e   : > { %3213 = vmatmul.mubr.f32.gmra.mrb[18].mxu1 %v4169_v28  ;;  %3083 = vmatprep.mubr.f32.mxu0 %v4189_v54 }
 0x18f   : > { %3215 = vmatprep.mubr.f32.mxu1 %v4189_v54 }
 0x191   : > { %3084 = vmatmul.mubr.f32.gmra.mrb[20].mxu0 %v4209_v9 }
 0x192   : > { %3216 = vmatmul.mubr.f32.gmra.mrb[20].mxu1 %v4209_v9  ;;  %3086 = vmatprep.mubr.f32.mxu0 %v4225_v18 }
 0x193   : > { %3218 = vmatprep.mubr.f32.mxu1 %v4225_v18 }
 0x195   : > { %3087 = vmatmul.mubr.f32.gmra.mrb[22].mxu0 %v3582_v52 }
 0x196   : > { %3219 = vmatmul.mubr.f32.gmra.mrb[22].mxu1 %v3582_v52 }
 0x25c   : > { %v3079_v6 = vpop.f32.mrb[16].mxu0 }
 0x25d   : > { %v1829_v28 = vadd.f32 %v3079_v6, %v2500_v49  ;;  %v3211_v54 = vpop.f32.mrb[16].mxu1  ;;  %v1774_v12 = vpop.f32.mrb[17].mxu0 }
 0x25e   : > { %v2218_v13 = vadd.f32 %v3211_v54, %v2500_v49  ;;  %v1828_v41 = vadd.f32 %v2500_v49, %v1774_v12  ;;  %v2170_v9 = vpop.f32.mrb[17].mxu1 }
 0x25f   : > { %v1837_v14 = vmax.f32 %v1829_v28, 0.0  ;;  %v2217_v15 = vadd.f32 %v2500_v49, %v2170_v9 }
 0x260   : > { %v2226_v16 = vmax.f32 %v2218_v13, 0.0  ;;  %v1836_v17 = vmax.f32 %v1828_v41, 0.0  ;;  %v3082_v18 = vpop.f32.mrb[18].mxu0 }
 0x261   : > { %v2225_v19 = vmax.f32 %v2217_v15, 0.0  ;;  %v1831_v52 = vadd.f32 %v3082_v18, %v2500_v49  ;;  %v3214_v20 = vpop.f32.mrb[18].mxu1  ;;  %v1784_v21 = vpop.f32.mrb[19].mxu0 }
 0x262   : > { %v2234_v22 = vmax.f32 %v1837_v14, %v2226_v16  ;;  %v2220_v23 = vadd.f32 %v3214_v20, %v2500_v49  ;;  %v1830_v24 = vadd.f32 %v2500_v49, %v1784_v21  ;;  %v2180_v26 = vpop.f32.mrb[19].mxu1 }
 0x263   : > { %v2233_v27 = vmax.f32 %v1836_v17, %v2225_v19  ;;  %v1839_v29 = vmax.f32 %v1831_v52, 0.0  ;;  %v2219_v30 = vadd.f32 %v2500_v49, %v2180_v26 }
 0x264   : > { %v2228_v31 = vmax.f32 %v2220_v23, 0.0  ;;  %v1838_v32 = vmax.f32 %v1830_v24, 0.0  ;;  %v3085_v33 = vpop.f32.mrb[20].mxu0 }
 0x265   : > { %v2241_v34 = vmax.f32 %v2233_v27, %v2234_v22  ;;  %v2227_v35 = vmax.f32 %v2219_v30, 0.0  ;;  %v1833_v36 = vadd.f32 %v3085_v33, %v2500_v49  ;;  %v3217_v37 = vpop.f32.mrb[20].mxu1  ;;  %v1794_v39 = vpop.f32.mrb[21].mxu0 }
 0x266   : > { %v2236_v5 = vmax.f32 %v1839_v29, %v2228_v31  ;;  %v2222_v42 = vadd.f32 %v3217_v37, %v2500_v49  ;;  %v1832_v43 = vadd.f32 %v2500_v49, %v1794_v39  ;;  %v2190_v44 = vpop.f32.mrb[21].mxu1 }
 0x267   : > { %2245 = vst.msk [vmem:[%s4362_s24] sm:$0xff] %vm388_vm0, %v2241_v34  ;;  %v2235_v45 = vmax.f32 %v1838_v32, %v2227_v35  ;;  %v1841_v46 = vmax.f32 %v1833_v36, 0.0  ;;  %v2221_v47 = vadd.f32 %v2500_v49, %v2190_v44 }
 0x268   : > { %v2230_v48 = vmax.f32 %v2222_v42, 0.0  ;;  %v1840_v50 = vmax.f32 %v1832_v43, 0.0  ;;  %v3088_v51 = vpop.f32.mrb[22].mxu0 }
 0x269   : > { %v2242_v53 = vmax.f32 %v2235_v45, %v2236_v5  ;;  %v2229_v55 = vmax.f32 %v2221_v47, 0.0  ;;  %v1835_v56 = vadd.f32 %v3088_v51, %v2500_v49  ;;  %v3220_v38 = vpop.f32.mrb[22].mxu1  ;;  %v1804_v40 = vpop.f32.mrb[23].mxu0 }
 0x26a   : > { %v2238_v57 = vmax.f32 %v1841_v46, %v2230_v48  ;;  %v2224_v58 = vadd.f32 %v3220_v38, %v2500_v49  ;;  %v1834_v59 = vadd.f32 %v2500_v49, %v1804_v40  ;;  %v2200_v60 = vpop.f32.mrb[23].mxu1 }
 0x26b   : > { %2246 = vst.msk [vmem:[%s4362_s24 + $0x8] sm:$0xff] %vm388_vm0, %v2242_v53  ;;  %v2237_v61 = vmax.f32 %v1840_v50, %v2229_v55  ;;  %v1843_v62 = vmax.f32 %v1835_v56, 0.0  ;;  %v2223_v63 = vadd.f32 %v2500_v49, %v2200_v60 }
 0x26c   : > { %v2232_v0 = vmax.f32 %v2224_v58, 0.0  ;;  %v1842_v25 = vmax.f32 %v1834_v59, 0.0 }
 0x26d   : > { %v2243_v1 = vmax.f32 %v2237_v61, %v2238_v57  ;;  %v2231_v2 = vmax.f32 %v2223_v63, 0.0  ;;  %2255 = sbr.rel (!%p3653_p5) target bundleno = 636 (0x27c), region = 90 }
 0x26e   : > { %v2240_v3 = vmax.f32 %v1843_v62, %v2232_v0  ;;  %v2291_v8 = vld [vmem:[%s4362_s24] sm:$0xff] (%p3653_p5) }
 0x26f   : > { %2247 = vst.msk [vmem:[%s4362_s24 + $0x10] sm:$0xff] %vm388_vm0, %v2243_v1  ;;  %v2239_v4 = vmax.f32 %v1842_v25, %v2231_v2  ;;  %2292 = vst [vmem:[%s2257_s17] sm:$0xff] (%p3653_p5), %v2291_v8 }
 0x271   : > { %v2244_v7 = vmax.f32 %v2239_v4, %v2240_v3 }
 0x272   : > { %v2293_v10 = vld [vmem:[%s4362_s24 + $0x8] sm:$0xff] (%p3653_p5) }
 0x273   : > { %2248 = vst.msk [vmem:[%s4362_s24 + $0x18] sm:$0xff] %vm388_vm0, %v2244_v7  ;;  %2294 = vst [vmem:[%s2257_s17 + $0x10] sm:$0xff] (%p3653_p5), %v2293_v10 }
 0x276   : > { %v2295_v11 = vld [vmem:[%s4362_s24 + $0x10] sm:$0xff] }
 0x277   : > { %2296 = vst [vmem:[%s2257_s17 + $0x20] sm:$0xff] %v2295_v11 }
 0x27a   : > { %v2297_v49 = vld [vmem:[%s4362_s24 + $0x18] sm:$0xff] }
 0x27b   : > { %2298 = vst [vmem:[%s2257_s17 + $0x30] sm:$0xff] %v2297_v49 }
 0x27c PF: > { %p14_p10 = scmp.ge.s32.totalorder %s3640_s28, 4   ;;  %s4402_s24 = smov %s3576_s25 }
 0x27d   : > { %s4403_s25 = smov %s3651_s8  ;;  %s4404_s26 = smov %s3640_s28 }
 0x27e   :  { %16 = sbr.rel (!%p14_p10) target bundleno = 2 (0x2), region = 167 }

</bundles_post_ra>
